<compile_context>
chip_gen: v6e
topology: v6e:2x2x1
jax: 0.10.0
libtpu: 0.0.40
codegen_flags: <defaults>
</compile_context>

<pallas_src>
import functools

import numpy as np
import jax
import jax.numpy as jnp
from jax.experimental import pallas as pl
from jax.experimental.pallas import tpu as pltpu

_CH = 128  # lane-dense channel padding for intermediate activations


def _round_up(x, m):
    return (x + m - 1) // m * m


def _vmem_limit_bytes():
    # generation-aware: ~half of physical VMEM (v5e/v6e 128 MiB -> 64 MiB, v7x 64 -> 32)
    try:
        cap = int(pltpu.get_tpu_info().vmem_capacity_bytes)
    except Exception:
        cap = 64 * 1024 * 1024
    return int(min(cap // 2, 96 * 1024 * 1024))


# ---------------------------------------------------------------------------
# Direct conv kernel (stride 1, kernel kh x kw, padding pre-applied), with an
# optional fused 1x1-head epilogue.  One sample's padded image is resident in
# VMEM; the output is row-blocked so the live f32 accumulator stays bounded.
# Per kernel row dh, the kw width-taps are lane-concatenated into one strip and
# contracted in a single K = kw*Cin MXU matmul (instead of kh*kw tiny matmuls).
# ---------------------------------------------------------------------------
def _conv_kernel(x_ref, w_ref, b_ref, *rest, R, Wo, kh, kw, Cin, relu, fuse_head):
    if fuse_head:
        wh_ref, bh_ref, o_ref = rest
    else:
        (o_ref,) = rest

    row0 = pl.program_id(1) * R
    cout = w_ref.shape[-1]

    # one dynamic ref read per grid step; everything below is static VMEM slicing
    blk = x_ref[0, pl.ds(row0, R + kh - 1), :, :]            # (R+kh-1, Wp, Cin) bf16

    acc = jnp.zeros((R * Wo, cout), jnp.float32)
    for dh in range(kh):
        parts = [blk[dh:dh + R, dw:dw + Wo, :] for dw in range(kw)]
        strip = parts[0] if kw == 1 else jnp.concatenate(parts, axis=-1)
        strip = strip.reshape(R * Wo, kw * Cin).astype(jnp.bfloat16)
        acc = acc + jnp.dot(strip, w_ref[dh], preferred_element_type=jnp.float32)

    acc = acc + b_ref[...]
    if relu:
        acc = jnp.maximum(acc, 0.0)

    if fuse_head:
        out = jnp.dot(acc.astype(jnp.bfloat16), wh_ref[...],
                      preferred_element_type=jnp.float32) + bh_ref[...]
    else:
        out = acc
    o_ref[...] = out[None].astype(o_ref.dtype)


def _direct_conv(x_pad, w_taps, bias, *, kh, kw, relu,
                 head_w=None, head_b=None, out_dtype=jnp.bfloat16):
    """x_pad:  (N, Hp, Wp, Cin) bf16, already spatially padded for a 'valid' kh x kw conv
       w_taps: (kh, kw*Cin, Cout_p) bf16     bias: (Cout_p,) f32
       head_w: (Cout_p, Kp) bf16 or None     head_b: (Kp,) f32
       returns (N, Ho*Wo, Cout_p or Kp) in out_dtype (bf16, channel-padded)."""
    N, Hp, Wp, Cin = x_pad.shape
    Ho, Wo = Hp - kh + 1, Wp - kw + 1
    Cout_p = w_taps.shape[-1]
    fuse_head = head_w is not None
    n_out = head_w.shape[-1] if fuse_head else Cout_p

    # row blocking: keep the live f32 accumulator <= ~2 MiB
    R = Ho
    for r in range(Ho, 0, -1):
        if Ho % r == 0 and (r == Ho or (r * Wo) % 8 == 0) \
                and r * Wo * Cout_p * 4 <= (2 << 20):
            R = r
            break
    n_rb = Ho // R

    vmem_guess = (2 * Hp * Wp * Cin * 2          # double-buffered bf16 image
                  + w_taps.size * 2 + (head_w.size * 2 if fuse_head else 0)
                  + 2 * R * Wo * n_out * 2       # double-buffered bf16 output block
                  + R * Wo * max(Cout_p, n_out) * 4)
    # TODO(synk): halo-tiled variant (spatial input blocking) for images too large to
    # keep resident in VMEM, and a Cout-tiled variant for Cout_p > one tile.
    assert vmem_guess < _vmem_limit_bytes(), "image too large for the direct-conv path"

    in_specs = [
        pl.BlockSpec((1, Hp, Wp, Cin), lambda n, r: (n, 0, 0, 0)),
        pl.BlockSpec((kh, kw * Cin, Cout_p), lambda n, r: (0, 0, 0)),
        pl.BlockSpec((1, Cout_p), lambda n, r: (0, 0)),
    ]
    args = [x_pad, w_taps, bias.reshape(1, Cout_p)]
    if fuse_head:
        Kp = head_w.shape[-1]
        in_specs += [pl.BlockSpec((Cout_p, Kp), lambda n, r: (0, 0)),
                     pl.BlockSpec((1, Kp), lambda n, r: (0, 0))]
        args += [head_w, head_b.reshape(1, Kp)]

    kernel = functools.partial(_conv_kernel, R=R, Wo=Wo, kh=kh, kw=kw,
                               Cin=Cin, relu=relu, fuse_head=fuse_head)
    flops = 2 * N * Ho * Wo * (kh * kw * Cin * Cout_p
                               + (Cout_p * n_out if fuse_head else 0))
    return pl.pallas_call(
        kernel,
        out_shape=jax.ShapeDtypeStruct((N, Ho * Wo, n_out), out_dtype),
        grid_spec=pltpu.PrefetchScalarGridSpec(
            num_scalar_prefetch=0,
            grid=(N, n_rb),
            in_specs=in_specs,
            out_specs=pl.BlockSpec((1, R * Wo, n_out), lambda n, r: (n, r, 0))),
        compiler_params=pltpu.CompilerParams(
            dimension_semantics=("parallel", "parallel"),
            vmem_limit_bytes=_vmem_limit_bytes()),
        cost_estimate=pl.CostEstimate(
            flops=flops, transcendentals=0,
            bytes_accessed=(N * Hp * Wp * Cin + kh * kw * Cin * Cout_p
                            + N * Ho * Wo * n_out) * 2),
    )(*args)


# ---------------------------------------------------------------------------
# Weight / input preparation
# ---------------------------------------------------------------------------
def _prep_backbone(x_nhwc, w, b, cout_p):
    """Stride-2 3x3 pad-1 conv  ->  stride-1 2x2 'valid' conv on a space-to-depth input.
       x_nhwc: (N,H,W,Cin) f32;  w: (Cout,Cin,3,3) torch layout;  b: (Cout,)."""
    N, H, W, Cin = x_nhwc.shape
    Cout = w.shape[0]
    Hp2, Wp2 = _round_up(H + 2, 2), _round_up(W + 2, 2)
    xp = jnp.pad(x_nhwc, ((0, 0), (1, Hp2 - H - 1), (1, Wp2 - W - 1), (0, 0)))
    # space-to-depth (factor 2): channel order (di, dj, c)
    x2 = xp.reshape(N, Hp2 // 2, 2, Wp2 // 2, 2, Cin)
    x2 = jnp.transpose(x2, (0, 1, 3, 2, 4, 5)).reshape(N, Hp2 // 2, Wp2 // 2, 4 * Cin)

    # remap the 3x3/stride-2 weights onto the 2x2/stride-1 space-to-depth grid
    wt = jnp.transpose(w, (2, 3, 1, 0))                       # (3,3,Cin,Cout)
    w2 = jnp.zeros((2, 2, 2, 2, Cin, Cout), w.dtype)
    for kh2 in range(2):
        for di in range(2):
            r = 2 * kh2 + di
            if r > 2:
                continue
            for kw2 in range(2):
                for dj in range(2):
                    s = 2 * kw2 + dj
                    if s > 2:
                        continue
                    w2 = w2.at[kh2, kw2, di, dj].set(wt[r, s])
    w2 = jnp.pad(w2.reshape(2, 2, 4 * Cin, Cout),
                 ((0, 0), (0, 0), (0, 0), (0, cout_p - Cout)))
    w_taps = w2.reshape(2, 2 * 4 * Cin, cout_p).astype(jnp.bfloat16)
    b_p = jnp.pad(b.astype(jnp.float32), (0, cout_p - Cout))
    return x2.astype(jnp.bfloat16), w_taps, b_p


def _prep_decoder(w, b, cin_p, cout_p):
    """3x3 stride-1 conv weights -> (kh, kw*cin_p, cout_p) strip layout (row order kw,cin)."""
    Cout, Cin, kh, kw = w.shape
    wt = jnp.transpose(w, (2, 3, 1, 0))                       # (kh,kw,Cin,Cout)
    wt = jnp.pad(wt, ((0, 0), (0, 0), (0, cin_p - Cin), (0, cout_p - Cout)))
    w_taps = wt.reshape(kh, kw * cin_p, cout_p).astype(jnp.bfloat16)
    b_p = jnp.pad(b.astype(jnp.float32), (0, cout_p - Cout))
    return w_taps, b_p


# ---------------------------------------------------------------------------
# Fused bilinear upsample (align_corners=False) in lane-dense NHWC
# height pass: A @ x  over Wd*C lanes ; width pass: batched contraction with B
# ---------------------------------------------------------------------------
def _bilinear_matrix_np(out_size, in_size):
    if out_size == in_size:
        return np.eye(out_size, dtype=np.float32)
    scale = in_size / out_size
    i = np.arange(out_size, dtype=np.float64)
    src = np.maximum((i + 0.5) * scale - 0.5, 0.0)
    x0 = np.clip(np.floor(src).astype(np.int64), 0, in_size - 1)
    x1 = np.minimum(x0 + 1, in_size - 1)
    lam = (src - x0).astype(np.float32)
    A = np.zeros((out_size, in_size), np.float32)
    A[np.arange(out_size), x0] += 1.0 - lam
    A[np.arange(out_size), x1] += lam
    return A


def _upsample_kernel(x_ref, a_ref, b_ref, o_ref, *, Wd, C, Hout, Wout):
    x = x_ref[0]                                                     # (Hd, Wd*C) bf16
    t = jnp.dot(a_ref[...], x, preferred_element_type=jnp.float32)   # (Hout, Wd*C)
    t = t.astype(jnp.bfloat16).reshape(Hout, Wd, C)
    bb = jnp.broadcast_to(b_ref[...][None], (Hout, Wout, Wd))        # bf16
    y = jnp.einsum('opw,owc->opc', bb, t,
                   preferred_element_type=jnp.float32)               # (Hout, Wout, C)
    o_ref[...] = y[None].astype(o_ref.dtype)


def bilinear_upsample_nhwc(x, Hout, Wout):
    """x: (N, Hd, Wd, C) bf16 with C a multiple of 128 -> (N, Hout, Wout, C) f32."""
    N, Hd, Wd, C = x.shape
    A = jnp.asarray(_bilinear_matrix_np(Hout, Hd)).astype(jnp.bfloat16)   # (Hout, Hd)
    B = jnp.asarray(_bilinear_matrix_np(Wout, Wd)).astype(jnp.bfloat16)   # (Wout, Wd)
    x2 = x.reshape(N, Hd, Wd * C)     # free metadata reshape in HBM (row-major)
    return pl.pallas_call(
        functools.partial(_upsample_kernel, Wd=Wd, C=C, Hout=Hout, Wout=Wout),
        out_shape=jax.ShapeDtypeStruct((N, Hout, Wout, C), jnp.float32),
        grid_spec=pltpu.PrefetchScalarGridSpec(
            num_scalar_prefetch=0,
            grid=(N,),
            in_specs=[pl.BlockSpec((1, Hd, Wd * C), lambda n: (n, 0, 0)),
                      pl.BlockSpec((Hout, Hd), lambda n: (0, 0)),
                      pl.BlockSpec((Wout, Wd), lambda n: (0, 0))],
            out_specs=pl.BlockSpec((1, Hout, Wout, C), lambda n: (n, 0, 0, 0))),
        compiler_params=pltpu.CompilerParams(
            dimension_semantics=("parallel",),
            vmem_limit_bytes=_vmem_limit_bytes()),
        cost_estimate=pl.CostEstimate(
            flops=2 * N * C * (Hout * Hd * Wd + Hout * Wout * Wd),
            transcendentals=0,
            bytes_accessed=N * (Hd * Wd * C * 2 + Hout * Wout * C * 4)),
    )(x2, A, B)


# ---------------------------------------------------------------------------
# ContrastiveSegmentationModel forward
# (backbone / decoder are the single Conv+ReLU stages of the test harness)
# ---------------------------------------------------------------------------
def contrastive_segmentation_forward(x, params, *, upsample=True,
                                     use_classification_head=True):
    N, Cin, H, W = x.shape
    x_nhwc = jnp.transpose(x, (0, 2, 3, 1))

    # ---- backbone: Conv2d(Cin, Cb, 3, stride=2, padding=1) + ReLU (direct, via s2d)
    Cb = params["w_bb"].shape[0]
    Cb_p = _round_up(max(Cb, _CH), _CH)
    x_s2d, w_bb, b_bb = _prep_backbone(x_nhwc, params["w_bb"], params["b_bb"], Cb_p)
    Hd, Wd = x_s2d.shape[1] - 1, x_s2d.shape[2] - 1
    feat = _direct_conv(x_s2d, w_bb, b_bb, kh=2, kw=2, relu=True)   # (N, Hd*Wd, Cb_p) bf16
    feat = feat.reshape(N, Hd, Wd, Cb_p)

    # ---- decoder conv (last layer -> Identity) + fused 1x1 heads in the epilogue
    Cd = params["w_dec"].shape[0]
    Cd_p = _round_up(max(Cd, _CH), _CH)
    K = params["w_head"].shape[0]
    n_heads = K + (1 if use_classification_head else 0)
    Kp = _round_up(max(n_heads, _CH), _CH)
    # TODO(synk): for Cd_p beyond a single output tile, split Cout and run the head as a
    # separate tiled matmul instead of fusing it into the epilogue.

    w_dec, b_dec = _prep_decoder(params["w_dec"], params["b_dec"], Cb_p, Cd_p)
    wh = params["w_head"].reshape(K, Cd).T                          # (Cd, K)
    bh = params["b_head"].astype(jnp.float32)
    if use_classification_head:
        wh = jnp.concatenate([wh, params["w_cls"].reshape(1, Cd).T], axis=1)
        bh = jnp.concatenate([bh, jnp.zeros((1,), jnp.float32)])    # cls head: bias=False
    wh_p = jnp.pad(wh, ((0, Cd_p - Cd), (0, Kp - n_heads))).astype(jnp.bfloat16)
    bh_p = jnp.pad(bh, (0, Kp - n_heads))

    feat_pad = jnp.pad(feat, ((0, 0), (1, 1), (1, 1), (0, 0)))      # decoder pad=1
    heads = _direct_conv(feat_pad, w_dec, b_dec, kh=3, kw=3, relu=True,
                         head_w=wh_p, head_b=bh_p)                  # (N, Hd*Wd, Kp) bf16
    heads = heads.reshape(N, Hd, Wd, Kp)

    # ---- bilinear upsample (align_corners=False), lane-dense NHWC
    if upsample:
        up = bilinear_upsample_nhwc(heads, H, W)                    # (N, H, W, Kp) f32
    else:
        up = heads.astype(jnp.float32)                              # (N, Hd, Wd, Kp)

    x_out = jnp.transpose(up[..., :K], (0, 3, 1, 2))                # NCHW
    if use_classification_head:
        sal = jnp.squeeze(up[..., K])          # matches torch .squeeze() on (N,1,h,w)
        return x_out, sal
    return x_out


# ---------------------------------------------------------------------------
if __name__ == "__main__":
    # small shapes: batch=2, in-channels=4, spatial=16x16
    N, Cin, H, W = 2, 4, 16, 16
    Cb, Cd, Kcls = 16, 32, 8          # backbone ch, decoder ch, head out-dim

    key = jax.random.PRNGKey(0)
    ks = jax.random.split(key, 8)
    x = jax.random.normal(ks[0], (N, Cin, H, W), jnp.float32)

    params = {
        "w_bb":   jax.random.normal(ks[1], (Cb, Cin, 3, 3), jnp.float32) / jnp.sqrt(Cin * 9.0),
        "b_bb":   jax.random.normal(ks[2], (Cb,), jnp.float32) * 0.01,
        "w_dec":  jax.random.normal(ks[3], (Cd, Cb, 3, 3), jnp.float32) / jnp.sqrt(Cb * 9.0),
        "b_dec":  jax.random.normal(ks[4], (Cd,), jnp.float32) * 0.01,
        "w_head": jax.random.normal(ks[5], (Kcls, Cd, 1, 1), jnp.float32) / jnp.sqrt(float(Cd)),
        "b_head": jax.random.normal(ks[6], (Kcls,), jnp.float32) * 0.01,
        "w_cls":  jax.random.normal(ks[7], (1, Cd, 1, 1), jnp.float32) / jnp.sqrt(float(Cd)),
    }

    fwd = jax.jit(functools.partial(contrastive_segmentation_forward,
                                    upsample=True, use_classification_head=True))
    out, sal = fwd(x, params)
    jax.block_until_ready(out)
    jax.block_until_ready(sal)

    assert out.shape == (N, Kcls, H, W), out.shape       # (2, 8, 16, 16)
    assert sal.shape == (N, H, W), sal.shape             # (2, 16, 16)
    assert bool(jnp.all(jnp.isfinite(out))) and bool(jnp.all(jnp.isfinite(sal)))
    print("KERNEL_OK")
</pallas_src>

<mosaic_0001>
module attributes {stable_mosaic.version = 11 : i64} {
  func.func @_conv_kernel(%arg0: i32, %arg1: i32, %arg2: memref<1x9x9x16xbf16, #tpu.memory_space<vmem>>, %arg3: memref<2x32x128xbf16, #tpu.memory_space<vmem>>, %arg4: memref<1x128xf32, #tpu.memory_space<vmem>>, %arg5: memref<1x64x128xbf16, #tpu.memory_space<vmem>>) attributes {dimension_semantics = [#tpu.dimension_semantics<parallel>, #tpu.dimension_semantics<parallel>], iteration_bounds = array<i64: 2, 1>, scalar_prefetch = 0 : i64, scratch_operands = 0 : i64, tpu.core_type = #tpu.core_type<tc>, window_params = [{transform_indices = @transform_0, window_bounds = array<i64: 1, 9, 9, 16>}, {pipeline_mode = #tpu.pipeline_mode<synchronous>, transform_indices = @transform_1, window_bounds = array<i64: 2, 32, 128>}, {pipeline_mode = #tpu.pipeline_mode<synchronous>, transform_indices = @transform_2, window_bounds = array<i64: 1, 128>}, {transform_indices = @transform_3, window_bounds = array<i64: 1, 64, 128>}]} {
    %c8_i32 = arith.constant 8 : i32
    %0 = arith.muli %arg1, %c8_i32 : i32
    %c0 = arith.constant 0 : index
    %1 = arith.index_cast %0 : i32 to index
    %c0_0 = arith.constant 0 : index
    %c0_1 = arith.constant 0 : index
    %2 = vector.load %arg2[%c0, %1, %c0_0, %c0_1] : memref<1x9x9x16xbf16, #tpu.memory_space<vmem>>, vector<1x9x9x16xbf16>
    %3 = vector.shape_cast %2 : vector<1x9x9x16xbf16> to vector<9x9x16xbf16>
    %cst = arith.constant 0.000000e+00 : f32
    %4 = vector.broadcast %cst : f32 to vector<64x128xf32>
    %5 = vector.extract_strided_slice %3 {offsets = [0, 0, 0], sizes = [8, 8, 16], strides = [1, 1, 1]} : vector<9x9x16xbf16> to vector<8x8x16xbf16>
    %6 = vector.extract_strided_slice %3 {offsets = [0, 1, 0], sizes = [8, 8, 16], strides = [1, 1, 1]} : vector<9x9x16xbf16> to vector<8x8x16xbf16>
    %7 = tpu.concatenate %5, %6 in 2 : vector<8x8x16xbf16>, vector<8x8x16xbf16> -> vector<8x8x32xbf16>
    %8 = vector.shape_cast %7 : vector<8x8x32xbf16> to vector<64x32xbf16>
    %c0_2 = arith.constant 0 : index
    %c0_3 = arith.constant 0 : index
    %c0_4 = arith.constant 0 : index
    %9 = vector.load %arg3[%c0_2, %c0_3, %c0_4] : memref<2x32x128xbf16, #tpu.memory_space<vmem>>, vector<1x32x128xbf16>
    %10 = vector.shape_cast %9 : vector<1x32x128xbf16> to vector<32x128xbf16>
    %cst_5 = arith.constant dense<0.000000e+00> : vector<64x128xf32>
    %11 = tpu.matmul %8, %10, %cst_5 {dimension_numbers = #tpu.dot_dimension_numbers<[1], [0], [0], [1], [0, 0, 1, 1], [], []>} : vector<64x32xbf16>, vector<32x128xbf16>, vector<64x128xf32> -> vector<64x128xf32>
    %12 = arith.addf %4, %11 : vector<64x128xf32>
    %13 = vector.extract_strided_slice %3 {offsets = [1, 0, 0], sizes = [8, 8, 16], strides = [1, 1, 1]} : vector<9x9x16xbf16> to vector<8x8x16xbf16>
    %14 = vector.extract_strided_slice %3 {offsets = [1, 1, 0], sizes = [8, 8, 16], strides = [1, 1, 1]} : vector<9x9x16xbf16> to vector<8x8x16xbf16>
    %15 = tpu.concatenate %13, %14 in 2 : vector<8x8x16xbf16>, vector<8x8x16xbf16> -> vector<8x8x32xbf16>
    %16 = vector.shape_cast %15 : vector<8x8x32xbf16> to vector<64x32xbf16>
    %c1 = arith.constant 1 : index
    %c0_6 = arith.constant 0 : index
    %c0_7 = arith.constant 0 : index
    %17 = vector.load %arg3[%c1, %c0_6, %c0_7] : memref<2x32x128xbf16, #tpu.memory_space<vmem>>, vector<1x32x128xbf16>
    %18 = vector.shape_cast %17 : vector<1x32x128xbf16> to vector<32x128xbf16>
    %cst_8 = arith.constant dense<0.000000e+00> : vector<64x128xf32>
    %19 = tpu.matmul %16, %18, %cst_8 {dimension_numbers = #tpu.dot_dimension_numbers<[1], [0], [0], [1], [0, 0, 1, 1], [], []>} : vector<64x32xbf16>, vector<32x128xbf16>, vector<64x128xf32> -> vector<64x128xf32>
    %20 = arith.addf %12, %19 : vector<64x128xf32>
    %c0_9 = arith.constant 0 : index
    %c0_10 = arith.constant 0 : index
    %21 = vector.load %arg4[%c0_9, %c0_10] : memref<1x128xf32, #tpu.memory_space<vmem>>, vector<1x128xf32>
    %22 = vector.broadcast %21 : vector<1x128xf32> to vector<64x128xf32>
    %23 = arith.addf %20, %22 : vector<64x128xf32>
    %cst_11 = arith.constant 0.000000e+00 : f32
    %24 = vector.broadcast %cst_11 : f32 to vector<64x128xf32>
    %25 = arith.maximumf %23, %24 : vector<64x128xf32>
    %26 = vector.shape_cast %25 : vector<64x128xf32> to vector<1x64x128xf32>
    %27 = arith.truncf %26 : vector<1x64x128xf32> to vector<1x64x128xbf16>
    %c0_12 = arith.constant 0 : index
    %c0_13 = arith.constant 0 : index
    %c0_14 = arith.constant 0 : index
    %28 = vector.load %arg5[%c0_12, %c0_13, %c0_14] : memref<1x64x128xbf16, #tpu.memory_space<vmem>>, vector<1x64x128xbf16>
    tpu.vector_store %arg5[%c0_12, %c0_13, %c0_14], %27 {strides = array<i32>} : memref<1x64x128xbf16, #tpu.memory_space<vmem>>, vector<1x64x128xbf16>,
    return
  }
  func.func @transform_0(%arg0: i32, %arg1: i32) -> (i32, i32, i32, i32) {
    %c0_i32 = arith.constant 0 : i32
    %c0_i32_0 = arith.constant 0 : i32
    %c0_i32_1 = arith.constant 0 : i32
    %c0_i32_2 = arith.constant 0 : i32
    return %arg0, %c0_i32, %c0_i32_0, %c0_i32_1 : i32, i32, i32, i32
  }
  func.func @transform_1(%arg0: i32, %arg1: i32) -> (i32, i32, i32) {
    %c0_i32 = arith.constant 0 : i32
    %c0_i32_0 = arith.constant 0 : i32
    %c0_i32_1 = arith.constant 0 : i32
    %c0_i32_2 = arith.constant 0 : i32
    return %c0_i32, %c0_i32_0, %c0_i32_1 : i32, i32, i32
  }
  func.func @transform_2(%arg0: i32, %arg1: i32) -> (i32, i32) {
    %c0_i32 = arith.constant 0 : i32
    %c0_i32_0 = arith.constant 0 : i32
    %c0_i32_1 = arith.constant 0 : i32
    return %c0_i32, %c0_i32_0 : i32, i32
  }
  func.func @transform_3(%arg0: i32, %arg1: i32) -> (i32, i32, i32) {
    %c0_i32 = arith.constant 0 : i32
    %c0_i32_0 = arith.constant 0 : i32
    return %arg0, %arg1, %c0_i32 : i32, i32, i32
  }
}

module attributes {stable_mosaic.version = 11 : i64} {
  func.func @_upsample_kernel(%arg0: i32, %arg1: memref<1x8x1024xbf16, #tpu.memory_space<vmem>>, %arg2: memref<16x8xbf16, #tpu.memory_space<vmem>>, %arg3: memref<16x8xbf16, #tpu.memory_space<vmem>>, %arg4: memref<1x16x16x128xf32, #tpu.memory_space<vmem>>) attributes {dimension_semantics = [#tpu.dimension_semantics<parallel>], iteration_bounds = array<i64: 2>, scalar_prefetch = 0 : i64, scratch_operands = 0 : i64, tpu.core_type = #tpu.core_type<tc>, window_params = [{transform_indices = @transform_0, window_bounds = array<i64: 1, 8, 1024>}, {pipeline_mode = #tpu.pipeline_mode<synchronous>, transform_indices = @transform_1, window_bounds = array<i64: 16, 8>}, {pipeline_mode = #tpu.pipeline_mode<synchronous>, transform_indices = @transform_2, window_bounds = array<i64: 16, 8>}, {transform_indices = @transform_3, window_bounds = array<i64: 1, 16, 16, 128>}]} {
    %c0 = arith.constant 0 : index
    %c0_0 = arith.constant 0 : index
    %c0_1 = arith.constant 0 : index
    %0 = vector.load %arg1[%c0, %c0_0, %c0_1] : memref<1x8x1024xbf16, #tpu.memory_space<vmem>>, vector<1x8x1024xbf16>
    %1 = vector.shape_cast %0 : vector<1x8x1024xbf16> to vector<8x1024xbf16>
    %c0_2 = arith.constant 0 : index
    %c0_3 = arith.constant 0 : index
    %2 = vector.load %arg2[%c0_2, %c0_3] : memref<16x8xbf16, #tpu.memory_space<vmem>>, vector<16x8xbf16>
    %cst = arith.constant dense<0.000000e+00> : vector<16x1024xf32>
    %3 = tpu.matmul %2, %1, %cst {dimension_numbers = #tpu.dot_dimension_numbers<[1], [0], [0], [1], [0, 0, 1, 1], [], []>} : vector<16x8xbf16>, vector<8x1024xbf16>, vector<16x1024xf32> -> vector<16x1024xf32>
    %4 = arith.truncf %3 : vector<16x1024xf32> to vector<16x1024xbf16>
    %5 = vector.shape_cast %4 : vector<16x1024xbf16> to vector<16x8x128xbf16>
    %c0_4 = arith.constant 0 : index
    %c0_5 = arith.constant 0 : index
    %6 = vector.load %arg3[%c0_4, %c0_5] : memref<16x8xbf16, #tpu.memory_space<vmem>>, vector<16x8xbf16>
    %7 = vector.shape_cast %6 : vector<16x8xbf16> to vector<1x16x8xbf16>
    %8 = vector.shape_cast %7 : vector<1x16x8xbf16> to vector<1x16x8xbf16>
    %9 = vector.broadcast %8 : vector<1x16x8xbf16> to vector<16x16x8xbf16>
    "tpu.trace_start"() <{level = 10 : i32, message = "opw,owc->opc"}> : () -> ()
    %cst_6 = arith.constant dense<0.000000e+00> : vector<16x16x128xf32>
    %10 = tpu.matmul %9, %5, %cst_6 {dimension_numbers = #tpu.dot_dimension_numbers<[2], [1], [1], [2], [0, 0, 0, 1, 1, 2], [0], [0]>} : vector<16x16x8xbf16>, vector<16x8x128xbf16>, vector<16x16x128xf32> -> vector<16x16x128xf32>
    "tpu.trace_stop"() : () -> ()
    %11 = vector.shape_cast %10 : vector<16x16x128xf32> to vector<1x16x16x128xf32>
    %c0_7 = arith.constant 0 : index
    %c0_8 = arith.constant 0 : index
    %c0_9 = arith.constant 0 : index
    %c0_10 = arith.constant 0 : index
    %12 = vector.load %arg4[%c0_7, %c0_8, %c0_9, %c0_10] : memref<1x16x16x128xf32, #tpu.memory_space<vmem>>, vector<1x16x16x128xf32>
    tpu.vector_store %arg4[%c0_7, %c0_8, %c0_9, %c0_10], %11 {strides = array<i32>} : memref<1x16x16x128xf32, #tpu.memory_space<vmem>>, vector<1x16x16x128xf32>,
    return
  }
  func.func @transform_0(%arg0: i32) -> (i32, i32, i32) {
    %c0_i32 = arith.constant 0 : i32
    %c0_i32_0 = arith.constant 0 : i32
    %c0_i32_1 = arith.constant 0 : i32
    return %arg0, %c0_i32, %c0_i32_0 : i32, i32, i32
  }
  func.func @transform_1(%arg0: i32) -> (i32, i32) {
    %c0_i32 = arith.constant 0 : i32
    %c0_i32_0 = arith.constant 0 : i32
    %c0_i32_1 = arith.constant 0 : i32
    return %c0_i32, %c0_i32_0 : i32, i32
  }
  func.func @transform_2(%arg0: i32) -> (i32, i32) {
    %c0_i32 = arith.constant 0 : i32
    %c0_i32_0 = arith.constant 0 : i32
    %c0_i32_1 = arith.constant 0 : i32
    return %c0_i32, %c0_i32_0 : i32, i32
  }
  func.func @transform_3(%arg0: i32) -> (i32, i32, i32, i32) {
    %c0_i32 = arith.constant 0 : i32
    %c0_i32_0 = arith.constant 0 : i32
    %c0_i32_1 = arith.constant 0 : i32
    %c0_i32_2 = arith.constant 0 : i32
    return %arg0, %c0_i32, %c0_i32_0, %c0_i32_1 : i32, i32, i32, i32
  }
}

module attributes {stable_mosaic.version = 11 : i64} {
  func.func @_conv_kernel(%arg0: i32, %arg1: i32, %arg2: memref<1x10x10x128xbf16, #tpu.memory_space<vmem>>, %arg3: memref<3x384x128xbf16, #tpu.memory_space<vmem>>, %arg4: memref<1x128xf32, #tpu.memory_space<vmem>>, %arg5: memref<128x128xbf16, #tpu.memory_space<vmem>>, %arg6: memref<1x128xf32, #tpu.memory_space<vmem>>, %arg7: memref<1x64x128xbf16, #tpu.memory_space<vmem>>) attributes {dimension_semantics = [#tpu.dimension_semantics<parallel>, #tpu.dimension_semantics<parallel>], iteration_bounds = array<i64: 2, 1>, scalar_prefetch = 0 : i64, scratch_operands = 0 : i64, tpu.core_type = #tpu.core_type<tc>, window_params = [{transform_indices = @transform_0, window_bounds = array<i64: 1, 10, 10, 128>}, {pipeline_mode = #tpu.pipeline_mode<synchronous>, transform_indices = @transform_1, window_bounds = array<i64: 3, 384, 128>}, {pipeline_mode = #tpu.pipeline_mode<synchronous>, transform_indices = @transform_2, window_bounds = array<i64: 1, 128>}, {pipeline_mode = #tpu.pipeline_mode<synchronous>, transform_indices = @transform_3, window_bounds = array<i64: 128, 128>}, {pipeline_mode = #tpu.pipeline_mode<synchronous>, transform_indices = @transform_4, window_bounds = array<i64: 1, 128>}, {transform_indices = @transform_5, window_bounds = array<i64: 1, 64, 128>}]} {
    %c8_i32 = arith.constant 8 : i32
    %0 = arith.muli %arg1, %c8_i32 : i32
    %c0 = arith.constant 0 : index
    %1 = arith.index_cast %0 : i32 to index
    %c0_0 = arith.constant 0 : index
    %c0_1 = arith.constant 0 : index
    %2 = vector.load %arg2[%c0, %1, %c0_0, %c0_1] : memref<1x10x10x128xbf16, #tpu.memory_space<vmem>>, vector<1x10x10x128xbf16>
    %3 = vector.shape_cast %2 : vector<1x10x10x128xbf16> to vector<10x10x128xbf16>
    %cst = arith.constant 0.000000e+00 : f32
    %4 = vector.broadcast %cst : f32 to vector<64x128xf32>
    %5 = vector.extract_strided_slice %3 {offsets = [0, 0, 0], sizes = [8, 8, 128], strides = [1, 1, 1]} : vector<10x10x128xbf16> to vector<8x8x128xbf16>
    %6 = vector.extract_strided_slice %3 {offsets = [0, 1, 0], sizes = [8, 8, 128], strides = [1, 1, 1]} : vector<10x10x128xbf16> to vector<8x8x128xbf16>
    %7 = vector.extract_strided_slice %3 {offsets = [0, 2, 0], sizes = [8, 8, 128], strides = [1, 1, 1]} : vector<10x10x128xbf16> to vector<8x8x128xbf16>
    %8 = tpu.concatenate %5, %6, %7 in 2 : vector<8x8x128xbf16>, vector<8x8x128xbf16>, vector<8x8x128xbf16> -> vector<8x8x384xbf16>
    %9 = vector.shape_cast %8 : vector<8x8x384xbf16> to vector<64x384xbf16>
    %c0_2 = arith.constant 0 : index
    %c0_3 = arith.constant 0 : index
    %c0_4 = arith.constant 0 : index
    %10 = vector.load %arg3[%c0_2, %c0_3, %c0_4] : memref<3x384x128xbf16, #tpu.memory_space<vmem>>, vector<1x384x128xbf16>
    %11 = vector.shape_cast %10 : vector<1x384x128xbf16> to vector<384x128xbf16>
    %cst_5 = arith.constant dense<0.000000e+00> : vector<64x128xf32>
    %12 = tpu.matmul %9, %11, %cst_5 {dimension_numbers = #tpu.dot_dimension_numbers<[1], [0], [0], [1], [0, 0, 1, 1], [], []>} : vector<64x384xbf16>, vector<384x128xbf16>, vector<64x128xf32> -> vector<64x128xf32>
    %13 = arith.addf %4, %12 : vector<64x128xf32>
    %14 = vector.extract_strided_slice %3 {offsets = [1, 0, 0], sizes = [8, 8, 128], strides = [1, 1, 1]} : vector<10x10x128xbf16> to vector<8x8x128xbf16>
    %15 = vector.extract_strided_slice %3 {offsets = [1, 1, 0], sizes = [8, 8, 128], strides = [1, 1, 1]} : vector<10x10x128xbf16> to vector<8x8x128xbf16>
    %16 = vector.extract_strided_slice %3 {offsets = [1, 2, 0], sizes = [8, 8, 128], strides = [1, 1, 1]} : vector<10x10x128xbf16> to vector<8x8x128xbf16>
    %17 = tpu.concatenate %14, %15, %16 in 2 : vector<8x8x128xbf16>, vector<8x8x128xbf16>, vector<8x8x128xbf16> -> vector<8x8x384xbf16>
    %18 = vector.shape_cast %17 : vector<8x8x384xbf16> to vector<64x384xbf16>
    %c1 = arith.constant 1 : index
    %c0_6 = arith.constant 0 : index
    %c0_7 = arith.constant 0 : index
    %19 = vector.load %arg3[%c1, %c0_6, %c0_7] : memref<3x384x128xbf16, #tpu.memory_space<vmem>>, vector<1x384x128xbf16>
    %20 = vector.shape_cast %19 : vector<1x384x128xbf16> to vector<384x128xbf16>
    %cst_8 = arith.constant dense<0.000000e+00> : vector<64x128xf32>
    %21 = tpu.matmul %18, %20, %cst_8 {dimension_numbers = #tpu.dot_dimension_numbers<[1], [0], [0], [1], [0, 0, 1, 1], [], []>} : vector<64x384xbf16>, vector<384x128xbf16>, vector<64x128xf32> -> vector<64x128xf32>
    %22 = arith.addf %13, %21 : vector<64x128xf32>
    %23 = vector.extract_strided_slice %3 {offsets = [2, 0, 0], sizes = [8, 8, 128], strides = [1, 1, 1]} : vector<10x10x128xbf16> to vector<8x8x128xbf16>
    %24 = vector.extract_strided_slice %3 {offsets = [2, 1, 0], sizes = [8, 8, 128], strides = [1, 1, 1]} : vector<10x10x128xbf16> to vector<8x8x128xbf16>
    %25 = vector.extract_strided_slice %3 {offsets = [2, 2, 0], sizes = [8, 8, 128], strides = [1, 1, 1]} : vector<10x10x128xbf16> to vector<8x8x128xbf16>
    %26 = tpu.concatenate %23, %24, %25 in 2 : vector<8x8x128xbf16>, vector<8x8x128xbf16>, vector<8x8x128xbf16> -> vector<8x8x384xbf16>
    %27 = vector.shape_cast %26 : vector<8x8x384xbf16> to vector<64x384xbf16>
    %c2 = arith.constant 2 : index
    %c0_9 = arith.constant 0 : index
    %c0_10 = arith.constant 0 : index
    %28 = vector.load %arg3[%c2, %c0_9, %c0_10] : memref<3x384x128xbf16, #tpu.memory_space<vmem>>, vector<1x384x128xbf16>
    %29 = vector.shape_cast %28 : vector<1x384x128xbf16> to vector<384x128xbf16>
    %cst_11 = arith.constant dense<0.000000e+00> : vector<64x128xf32>
    %30 = tpu.matmul %27, %29, %cst_11 {dimension_numbers = #tpu.dot_dimension_numbers<[1], [0], [0], [1], [0, 0, 1, 1], [], []>} : vector<64x384xbf16>, vector<384x128xbf16>, vector<64x128xf32> -> vector<64x128xf32>
    %31 = arith.addf %22, %30 : vector<64x128xf32>
    %c0_12 = arith.constant 0 : index
    %c0_13 = arith.constant 0 : index
    %32 = vector.load %arg4[%c0_12, %c0_13] : memref<1x128xf32, #tpu.memory_space<vmem>>, vector<1x128xf32>
    %33 = vector.broadcast %32 : vector<1x128xf32> to vector<64x128xf32>
    %34 = arith.addf %31, %33 : vector<64x128xf32>
    %cst_14 = arith.constant 0.000000e+00 : f32
    %35 = vector.broadcast %cst_14 : f32 to vector<64x128xf32>
    %36 = arith.maximumf %34, %35 : vector<64x128xf32>
    %37 = arith.truncf %36 : vector<64x128xf32> to vector<64x128xbf16>
    %c0_15 = arith.constant 0 : index
    %c0_16 = arith.constant 0 : index
    %38 = vector.load %arg5[%c0_15, %c0_16] : memref<128x128xbf16, #tpu.memory_space<vmem>>, vector<128x128xbf16>
    %cst_17 = arith.constant dense<0.000000e+00> : vector<64x128xf32>
    %39 = tpu.matmul %37, %38, %cst_17 {dimension_numbers = #tpu.dot_dimension_numbers<[1], [0], [0], [1], [0, 0, 1, 1], [], []>} : vector<64x128xbf16>, vector<128x128xbf16>, vector<64x128xf32> -> vector<64x128xf32>
    %c0_18 = arith.constant 0 : index
    %c0_19 = arith.constant 0 : index
    %40 = vector.load %arg6[%c0_18, %c0_19] : memref<1x128xf32, #tpu.memory_space<vmem>>, vector<1x128xf32>
    %41 = vector.broadcast %40 : vector<1x128xf32> to vector<64x128xf32>
    %42 = arith.addf %39, %41 : vector<64x128xf32>
    %43 = vector.shape_cast %42 : vector<64x128xf32> to vector<1x64x128xf32>
    %44 = arith.truncf %43 : vector<1x64x128xf32> to vector<1x64x128xbf16>
    %c0_20 = arith.constant 0 : index
    %c0_21 = arith.constant 0 : index
    %c0_22 = arith.constant 0 : index
    %45 = vector.load %arg7[%c0_20, %c0_21, %c0_22] : memref<1x64x128xbf16, #tpu.memory_space<vmem>>, vector<1x64x128xbf16>
    tpu.vector_store %arg7[%c0_20, %c0_21, %c0_22], %44 {strides = array<i32>} : memref<1x64x128xbf16, #tpu.memory_space<vmem>>, vector<1x64x128xbf16>,
    return
  }
  func.func @transform_0(%arg0: i32, %arg1: i32) -> (i32, i32, i32, i32) {
    %c0_i32 = arith.constant 0 : i32
    %c0_i32_0 = arith.constant 0 : i32
    %c0_i32_1 = arith.constant 0 : i32
    %c0_i32_2 = arith.constant 0 : i32
    return %arg0, %c0_i32, %c0_i32_0, %c0_i32_1 : i32, i32, i32, i32
  }
  func.func @transform_1(%arg0: i32, %arg1: i32) -> (i32, i32, i32) {
    %c0_i32 = arith.constant 0 : i32
    %c0_i32_0 = arith.constant 0 : i32
    %c0_i32_1 = arith.constant 0 : i32
    %c0_i32_2 = arith.constant 0 : i32
    return %c0_i32, %c0_i32_0, %c0_i32_1 : i32, i32, i32
  }
  func.func @transform_2(%arg0: i32, %arg1: i32) -> (i32, i32) {
    %c0_i32 = arith.constant 0 : i32
    %c0_i32_0 = arith.constant 0 : i32
    %c0_i32_1 = arith.constant 0 : i32
    return %c0_i32, %c0_i32_0 : i32, i32
  }
  func.func @transform_3(%arg0: i32, %arg1: i32) -> (i32, i32) {
    %c0_i32 = arith.constant 0 : i32
    %c0_i32_0 = arith.constant 0 : i32
    %c0_i32_1 = arith.constant 0 : i32
    return %c0_i32, %c0_i32_0 : i32, i32
  }
  func.func @transform_4(%arg0: i32, %arg1: i32) -> (i32, i32) {
    %c0_i32 = arith.constant 0 : i32
    %c0_i32_0 = arith.constant 0 : i32
    %c0_i32_1 = arith.constant 0 : i32
    return %c0_i32, %c0_i32_0 : i32, i32
  }
  func.func @transform_5(%arg0: i32, %arg1: i32) -> (i32, i32, i32) {
    %c0_i32 = arith.constant 0 : i32
    %c0_i32_0 = arith.constant 0 : i32
    return %arg0, %arg1, %c0_i32 : i32, i32, i32
  }
}

</mosaic_0001>

<bundles_post_ra>
// kernel: contrastive_segmentation_forward.3
= control target key start
LH: loop header
LB: loop body
LE: loop exit
PB: predicated region body
PF: predicated region fallthrough
CT: control target
= control target key end

     0   :  { %s935_s12 = smov 0   ;;  %s937_s13 = smov 0   ;;  %s1069_s0 = inlined_call_operand.vmem [shape: bf16[2,9,9,16], index: 0, kind: input, shape index: {}]   ;;  %s1070_s1 = inlined_call_operand.vmem [shape: bf16[2,32,128], index: 1, kind: input, shape index: {}]   ;;  %s1071_s2 = inlined_call_operand.vmem [shape: f32[1,128], index: 2, kind: input, shape index: {}]   ;;  %s1072_s3 = inlined_call_operand.vmem [shape: bf16[2,64,128], index: 3, kind: output, shape index: {}]  }
   0x1   :  { %s939_s14 = smov 0  }
   0x2 LB: > { %s25_s15 = sadd.s32 1, %s908_s13  ;;  %p735_p0 = scmp.ge.s32.totalorder %s912_s14, 1  ;;  %s912_s14 = sphi %s939_s14, %s13_s14   ;;  %s908_s13 = sphi %s937_s13, %s1074_s13   ;;  %s904_s12 = sphi %s935_s12, %s1073_s12  }
   0x3   : > { %p27_p1 = scmp.ge.s32.totalorder %s25_s15, 2  ;;  %p151_p2 = scmp.lt.s32.totalorder %s912_s14, 3 }
   0x5   : > { %s1076_s15 = smov (%p27_p1, %s25_s15), 0  ;;  %p152_p3 = pnand %p735_p0, %p151_p2 }
   0x6   : > { %p179_p4 = scmp.lt.s32.totalorder (!%p152_p3), %s904_s12, 1  ;;  %s914_s28 = smov (!%p152_p3), 16  }
   0x7   : > { %155 = sbr.rel (%p152_p3) target bundleno = 368 (0x170), region = 32 }
   0xc   : > { %s1078_s12 = smov (!%p179_p4, %s904_s12), 1  ;;  %v886_v0 = vld [vmem:[%s1070_s1 + $0x8] sm:$0xff]   ;;  %v887_v1 = vld [vmem:[%s1070_s1 + $0x18] sm:$0xff]   ;;  %v888_v2 = vld [vmem:[%s1070_s1] sm:$0xff]   ;;  %vm329_vm0 = vcmask 130048   ;;  %vm412_vm1 = vcmask 261120  }
   0xd   : > { %s851_s18 = smul.u32 72, %s1078_s12  ;;  %839 = vmatprep.subr.bf16.mxu1 %v886_v0  ;;  %827 = vmatprep.subr.bf16.mxu0 %v887_v1  ;;  %v889_v30 = vld [vmem:[%s1070_s1 + $0x10] sm:$0xff]   ;;  %s783_s4 = sshll.u32 %s1078_s12, 5 }
   0xe   : > { %840 = vmatpush3.bf16.msra.mxu1 %v886_v0  ;;  %828 = vmatpush3.bf16.msra.mxu0 %v887_v1  ;;  %s192_s7 = scalar_lea.vmem %s1072_s3, %s783_s4 }
   0xf   : > { %s965_s23 = scalar_lea.vmem %s1069_s0, %s851_s18  ;;  %841 = vmatprep.subr.bf16.mxu1 %v888_v2  ;;  %829 = vmatprep.subr.bf16.mxu0 %v889_v30 }
  0x10   : > { %v971_v3 = vld [vmem:[%s965_s23 + $0x10] sm:$0xf]  ;;  %v204_v4 = vld [vmem:[%s965_s23 + $0x14] sm:$0x1]  ;;  %v975_v5 = vld [vmem:[%s965_s23] sm:$0xf] }
  0x11   : > { %v741_v6 = vcombine.low %v971_v3, %v204_v4  ;;  %v200_v7 = vld [vmem:[%s965_s23 + $0x4] sm:$0x1]  ;;  %v980_v8 = vld [vmem:[%s965_s23 + $0x18] sm:$0xf]  ;;  %v206_v9 = vld [vmem:[%s965_s23 + $0x1c] sm:$0x1] }
  0x12   : > { %v739_v10 = vcombine.low %v975_v5, %v200_v7  ;;  %v742_v11 = vcombine.low %v980_v8, %v206_v9  ;;  %v986_v12 = vld [vmem:[%s965_s23 + $0x8] sm:$0xf]  ;;  %v202_v13 = vld [vmem:[%s965_s23 + $0xc] sm:$0x1]  ;;  %842 = vmatpush3.bf16.msra.mxu1 %v888_v2  ;;  %v995_v19 = vld [vmem:[%s965_s23 + $0x20] sm:$0xf]  ;;  %830 = vmatpush3.bf16.msra.mxu0 %v889_v30 }
  0x13   : > { %v990_v14 = vld [vmem:[%s965_s23 + $0x28] sm:$0xf]  ;;  %v272_v15 = vshrl.u32 %v741_v6, 16  ;;  %v274_v16 = vshll.u32 %v741_v6, 16  ;;  %v740_v17 = vcombine.low %v986_v12, %v202_v13  ;;  %v210_v18 = vld [vmem:[%s965_s23 + $0x2c] sm:$0x1] }
  0x14   : > { %v258_v20 = vshrl.u32 %v739_v10, 16  ;;  %v260_v21 = vshll.u32 %v739_v10, 16  ;;  %v279_v22 = vshrl.u32 %v742_v11, 16  ;;  %v281_v23 = vshll.u32 %v742_v11, 16  ;;  %v208_v24 = vld [vmem:[%s965_s23 + $0x24] sm:$0x1] }
  0x15   : > { %v276_v25 = vrot.slane %v274_v16, 1  ;;  %v265_v26 = vshrl.u32 %v740_v17, 16  ;;  %v267_v27 = vshll.u32 %v740_v17, 16  ;;  %v744_v28 = vcombine.low %v990_v14, %v210_v18  ;;  %v1000_v29 = vld [vmem:[%s965_s23 + $0x38] sm:$0xf] }
  0x16   : > { %v262_v31 = vrot.slane %v260_v21, 1  ;;  %v283_v32 = vrot.slane %v281_v23, 1  ;;  %v743_v33 = vcombine.low %v995_v19, %v208_v24  ;;  %v214_v34 = vld [vmem:[%s965_s23 + $0x3c] sm:$0x1]  ;;  %v1008_v35 = vld [vmem:[%s965_s23 + $0x30] sm:$0xf] }
  0x17   : > { %v277_v36 = vor.u32 %v276_v25, %v272_v15  ;;  %v269_v37 = vrot.slane %v267_v27, 1  ;;  %v295_v38 = vshll.u32 %v744_v28, 16  ;;  %v212_v39 = vld [vmem:[%s965_s23 + $0x34] sm:$0x1]  ;;  %v293_v41 = vshrl.u32 %v744_v28, 16 }
  0x18   : > { %v263_v40 = vor.u32 %v262_v31, %v258_v20  ;;  %v288_v42 = vshll.u32 %v743_v33, 16  ;;  %v1012_v43 = vld [vmem:[%s965_s23 + $0x40] sm:$0xf]  ;;  %v216_v44 = vld [vmem:[%s965_s23 + $0x44] sm:$0x1]  ;;  %v284_v45 = vor.u32 %v283_v32, %v279_v22  ;;  %v746_v47 = vcombine.low %v1000_v29, %v214_v34 }
  0x19   : > { %317 = vrot.lane.b32.xlu1 %v277_v36, %s914_s28  ;;  %v297_v46 = vrot.slane %v295_v38, 1  ;;  %v745_v48 = vcombine.low %v1008_v35, %v212_v39  ;;  %v270_v49 = vor.u32 %v269_v37, %v265_v26  ;;  %v286_v50 = vshrl.u32 %v743_v33, 16  ;;  %v772_v34 = vld [vmem:[%s1071_s2] ss:$0 sm:$0xff] }
  0x1a   : > { %313 = vrot.lane.b32.xlu0 %v263_v40, %s914_s28  ;;  %v290_v51 = vrot.slane %v288_v42, 1  ;;  %v747_v52 = vcombine.low %v1012_v43, %v216_v44  ;;  %v309_v53 = vshll.u32 %v746_v47, 16  ;;  %v307_v56 = vshrl.u32 %v746_v47, 16 }
  0x1b   : > { %v302_v54 = vshll.u32 %v745_v48, 16  ;;  %v298_v55 = vor.u32 %v297_v46, %v293_v41  ;;  %v300_v59 = vshrl.u32 %v745_v48, 16 }
  0x1c   : > { %v311_v57 = vrot.slane %v309_v53, 1  ;;  %v291_v58 = vor.u32 %v290_v51, %v286_v50  ;;  %v366_v61 = vshll.u32 %v747_v52, 16  ;;  %v364_v0 = vshrl.u32 %v747_v52, 16 }
  0x1d   : > { %319 = vrot.lane.b32.xlu1 %v284_v45, %s914_s28  ;;  %v304_v60 = vrot.slane %v302_v54, 1 }
  0x1e   : > { %315 = vrot.lane.b32.xlu0 %v270_v49, %s914_s28  ;;  %v312_v62 = vor.u32 %v311_v57, %v307_v56  ;;  %v368_v1 = vrot.slane %v366_v61, 1 }
  0x1f   : > { %v305_v63 = vor.u32 %v304_v60, %v300_v59 }
  0x20   : > { %v369_v2 = vor.u32 %v368_v1, %v364_v0 }
  0x21   : > { %323 = vrot.lane.b32.xlu1 %v298_v55, %s914_s28 }
  0x22   : > { %321 = vrot.lane.b32.xlu0 %v291_v58, %s914_s28 }
  0x25   : > { %327 = vrot.lane.b32.xlu1 %v312_v62, %s914_s28 }
  0x26   : > { %325 = vrot.lane.b32.xlu0 %v305_v63, %s914_s28 }
  0x2a   : > { %370 = vrot.lane.b32.xlu0 %v369_v2, %s914_s28 }
  0x8b   : > { %v318_v4 = vpop.permute.xlu1 %317 }
  0x8c   : > { %v314_v6 = vpop.permute.xlu0 %313  ;;  %v338_v7 = vsel %vm329_vm0, %v971_v3, %v318_v4 }
  0x8d   : > { %v332_v13 = vsel %vm329_vm0, %v975_v5, %v314_v6 }
  0x8f   : > { %v320_v9 = vpop.permute.xlu1 %319 }
  0x90   : > { %v341_v10 = vsel %vm329_vm0, %v980_v8, %v320_v9  ;;  %v316_v11 = vpop.permute.xlu0 %315 }
  0x91   : > { %v763_v15 = vcombine.low %v338_v7, %v341_v10  ;;  %v335_v16 = vsel %vm329_vm0, %v986_v12, %v316_v11 }
  0x92   : > { %v752_v17 = vcombine.low %v335_v16, %v338_v7  ;;  %v762_v18 = vcombine.low %v332_v13, %v335_v16 }
  0x93   : > { %v324_v20 = vpop.permute.xlu1 %323 }
  0x94   : > { %v347_v21 = vsel %vm329_vm0, %v990_v14, %v324_v20  ;;  %831 = vmatprep.mubr.msk.bf16.mxu0 %vm412_vm1, %v752_v17  ;;  %843 = vmatprep.mubr.msk.bf16.mxu1 %vm412_vm1, %v762_v18  ;;  %v322_v3 = vpop.permute.xlu0 %321 }
  0x95   : > { %v344_v8 = vsel %vm329_vm0, %v995_v19, %v322_v3  ;;  %844 = vmatmul.mubr.msk.bf16.vlgmr.msra.gmra.mxu1 %vm412_vm1, %v763_v15 }
  0x96   : > { %v753_v5 = vcombine.low %v341_v10, %v344_v8  ;;  %v764_v22 = vcombine.low %v344_v8, %v347_v21 }
  0x97   : > { %v328_v12 = vpop.permute.xlu1 %327 }
  0x98   : > { %v353_v23 = vsel %vm329_vm0, %v1000_v29, %v328_v12  ;;  %832 = vmatmul.mubr.msk.bf16.vlgmr.msra.gmra.mxu0 %vm412_vm1, %v753_v5  ;;  %847 = vmatprep.mubr.msk.bf16.mxu1 %vm412_vm1, %v764_v22  ;;  %v326_v14 = vpop.permute.xlu0 %325 }
  0x99   : > { %v350_v24 = vsel %vm329_vm0, %v1008_v35, %v326_v14 }
  0x9a   : > { %v754_v25 = vcombine.low %v347_v21, %v350_v24  ;;  %v765_v26 = vcombine.low %v350_v24, %v353_v23 }
  0x9c   : > { %835 = vmatprep.mubr.msk.bf16.mxu0 %vm412_vm1, %v754_v25  ;;  %v371_v19 = vpop.permute.xlu0 %370 }
  0x9d   : > { %v374_v27 = vsel %vm329_vm0, %v1012_v43, %v371_v19  ;;  %848 = vmatmul.mubr.msk.bf16.gmra.mxu1 %vm412_vm1, %v765_v26 }
  0x9e   : > { %v755_v28 = vcombine.low %v353_v23, %v374_v27 }
  0xa0   : > { %836 = vmatmul.mubr.msk.bf16.gmra.mxu0 %vm412_vm1, %v755_v28 }
 0x155   : > { %v845_v29 = vpop.f32.mrf.mxu1 }
 0x157   : > { %v554_v30 = vpop.f32.mrf.mxu1 }
 0x158   : > { %v833_v31 = vpop.f32.mrf.mxu0 }
 0x159   : > { %v563_v32 = vadd.f32 %v845_v29, %v833_v31  ;;  %v846_v33 = vpop.f32.mrf.mxu1 }
 0x15a   : > { %v459_v35 = vpop.f32.mrf.mxu0 }
 0x15b   : > { %v555_v36 = vadd.f32 %v554_v30, %v459_v35  ;;  %v557_v37 = vpop.f32.mrf.mxu1  ;;  %v594_v39 = vadd.f32 %v772_v34, %v563_v32 }
 0x15c   : > { %v834_v38 = vpop.f32.mrf.mxu0 }
 0x15d   : > { %v566_v40 = vadd.f32 %v846_v33, %v834_v38  ;;  %v849_v41 = vpop.f32.mrf.mxu1  ;;  %v592_v43 = vadd.f32 %v772_v34, %v555_v36  ;;  %v602_v48 = vmax.f32 %v594_v39, 0.0 }
 0x15e   : > { %v462_v42 = vpop.f32.mrf.mxu0 }
 0x15f   : > { %v595_v44 = vadd.f32 %v772_v34, %v566_v40  ;;  %v558_v45 = vadd.f32 %v557_v37, %v462_v42  ;;  %v570_v46 = vpop.f32.mrf.mxu1  ;;  %v600_v54 = vmax.f32 %v592_v43, 0.0 }
 0x160   : > { %v837_v47 = vpop.f32.mrf.mxu0 }
 0x161   : > { %v603_v49 = vmax.f32 %v595_v44, 0.0  ;;  %v593_v50 = vadd.f32 %v772_v34, %v558_v45  ;;  %v579_v51 = vadd.f32 %v849_v41, %v837_v47  ;;  %v850_v52 = vpop.f32.mrf.mxu1 }
 0x162   : > { %v475_v53 = vpop.f32.mrf.mxu0 }
 0x163   : > { %v800_v55 = vpack.c.bf16 %v603_v49, %v602_v48  ;;  %v601_v56 = vmax.f32 %v593_v50, 0.0  ;;  %v571_v57 = vadd.f32 %v570_v46, %v475_v53  ;;  %v598_v60 = vadd.f32 %v772_v34, %v579_v51  ;;  %v573_v62 = vpop.f32.mrf.mxu1 }
 0x164   : > { %v838_v58 = vpop.f32.mrf.mxu0 }
 0x165   : > { %812 = vst [vmem:[%s192_s7 + $0x8] sm:$0xff] %v800_v55   ;;  %v795_v59 = vpack.c.bf16 %v601_v56, %v600_v54  ;;  %v582_v61 = vadd.f32 %v850_v52, %v838_v58  ;;  %v596_v0 = vadd.f32 %v772_v34, %v571_v57  ;;  %v606_v4 = vmax.f32 %v598_v60, 0.0 }
 0x166   : > { %v478_v63 = vpop.f32.mrf.mxu0 }
 0x167   : > { %796 = vst [vmem:[%s192_s7] sm:$0xff] %v795_v59   ;;  %v599_v1 = vadd.f32 %v772_v34, %v582_v61  ;;  %v574_v2 = vadd.f32 %v573_v62, %v478_v63  ;;  %v604_v9 = vmax.f32 %v596_v0, 0.0 }
 0x169   : > { %v607_v6 = vmax.f32 %v599_v1, 0.0  ;;  %v597_v7 = vadd.f32 %v772_v34, %v574_v2 }
 0x16b   : > { %v810_v10 = vpack.c.bf16 %v607_v6, %v606_v4  ;;  %v605_v11 = vmax.f32 %v597_v7, 0.0 }
 0x16d   : > { %814 = vst [vmem:[%s192_s7 + $0x18] sm:$0xff] %v810_v10   ;;  %v805_v13 = vpack.c.bf16 %v605_v11, %v604_v9 }
 0x16f   : > { %813 = vst [vmem:[%s192_s7 + $0x10] sm:$0xff] %v805_v13  }
 0x170 PF: > { %s13_s14 = sadd.s32 1, %s912_s14   ;;  %s1073_s12 = smov %s908_s13 }
 0x171   : > { %p10_p5 = scmp.ge.s32.totalorder %s13_s14, 4   ;;  %s1074_s13 = smov %s1076_s15 }
 0x173   :  { %12 = sbr.rel (!%p10_p5) target bundleno = 2 (0x2), region = 64 }

// kernel: contrastive_segmentation_forward.5
= control target key start
LH: loop header
LB: loop body
LE: loop exit
PB: predicated region body
PF: predicated region fallthrough
CT: control target
= control target key end

     0   :  { %s1612_s12 = smov 0   ;;  %s1819_s0 = inlined_call_operand.vmem [shape: bf16[2,8,1024], index: 0, kind: input, shape index: {}]   ;;  %s1820_s1 = inlined_call_operand.vmem [shape: bf16[16,8], index: 1, kind: input, shape index: {}, may-alias: {1,2}]   ;;  %s1821_s2 = inlined_call_operand.vmem [shape: bf16[16,8], index: 2, kind: input, shape index: {}, may-alias: {1,2}]   ;;  %s1822_s3 = inlined_call_operand.vmem [shape: f32[2,16,16,128], index: 3, kind: output, shape index: {}]  }
   0x1 LB: > { %s1381_s13 = sadd.s32 4294967295, %s1585_s12   ;;  %p1385_p0 = scmp.ge.s32.totalorder %s1585_s12, 1  ;;  %s1585_s12 = sphi %s1612_s12, %s13_s12  }
   0x2   : > { %p137_p1 = scmp.lt.s32.totalorder %s1585_s12, 3 }
   0x4   : > { %p138_p2 = pnand %p1385_p0, %p137_p1 }
   0x5   : > { %p161_p3 = scmp.lt.s32.totalorder (!%p138_p2), %s1381_s13, 1 }
   0x6   : > { %141 = sbr.rel (%p138_p2) target bundleno = 501 (0x1f5), region = 32 }
   0xb   : > { %v1587_v0 = vmov 0   ;;  %s1824_s13 = smov (!%p161_p3, %s1381_s13), 1  ;;  %vm207_vm0 = vcmask 1043456   ;;  %v1573_v15 = vld [vmem:[%s1820_s1] sm:$0xff]   ;;  %vm203_vm1 = vcmask 64512   ;;  %v1588_v18 = vmov 0.0  }
   0xc   : > { %264 = vmatprep.mubr.bf16.mxu0 %v1587_v0  ;;  %307 = vmatprep.mubr.bf16.mxu1 %v1587_v0  ;;  %s1426_s14 = sshll.u32 %s1824_s13, 5  ;;  %vm1589_vm2 = vmmov 0   ;;  %v1590_v27 = vmov 1983009808   ;;  %v449_v29 = vlaneseq  ;;  %v1591_v47 = vmov 1934713408  }
   0xd   : > { %s165_s17 = scalar_lea.vmem %s1819_s0, %s1426_s14  ;;  %v447_v28 = vunpack.c.l.s4 %v1590_v27  ;;  %v479_v48 = vunpack.c.l.s4 %v1591_v47  ;;  %s1427_s22 = sshll.u32 %s1824_s13, 8 }
   0xe   : > { %v172_v1 = vld [vmem:[%s165_s17] sm:$0xff]  ;;  %v173_v2 = vld [vmem:[%s165_s17 + $0x8] sm:$0xff]  ;;  %v174_v3 = vld [vmem:[%s165_s17 + $0x10] sm:$0xff]  ;;  %v450_v35 = vshrl.u32 %v449_v29, 7  ;;  %s1782_s25 = scalar_lea.vmem %s1822_s3, %s1427_s22 }
   0xf   : > { %v1392_v4 = vcombine.high %v172_v1, %v172_v1  ;;  %v1394_v5 = vcombine.high %v173_v2, %v173_v2  ;;  %v1391_v6 = vcombine.low %v172_v1, %v172_v1  ;;  %v1393_v7 = vcombine.low %v173_v2, %v173_v2  ;;  %v175_v8 = vld [vmem:[%s165_s17 + $0x18] sm:$0xff] }
  0x10   : > { %v1396_v9 = vcombine.high %v174_v3, %v174_v3  ;;  %v1398_v10 = vcombine.high %v175_v8, %v175_v8  ;;  %v1395_v11 = vcombine.low %v174_v3, %v174_v3  ;;  %v1397_v12 = vcombine.low %v175_v8, %v175_v8 }
  0x11   : > { %1399 = vmatprep.subr.msk.bf16.mxu0 %vm207_vm0, %v1392_v4  ;;  %1401 = vmatprep.subr.msk.bf16.mxu1 %vm207_vm0, %v1394_v5  ;;  %v209_v13 = vsel %vm207_vm0, %v1391_v6, 0  ;;  %v215_v14 = vsel %vm207_vm0, %v1393_v7, 0  ;;  %v448_v34 = vunpack.c.0.s8 %v447_v28  ;;  %v480_v63 = vunpack.c.0.s8 %v479_v48 }
  0x12   : > { %247 = vmatpush1.bf16.msra.mxu0 %v209_v13  ;;  %290 = vmatpush1.bf16.msra.mxu1 %v215_v14  ;;  %v221_v16 = vsel %vm207_vm0, %v1395_v11, 0  ;;  %v227_v17 = vsel %vm207_vm0, %v1397_v12, 0 }
  0x13   : > { %1403 = vmatprep.subr.msk.bf16.mxu0 %vm207_vm0, %v1396_v9  ;;  %1405 = vmatprep.subr.msk.bf16.mxu1 %vm207_vm0, %v1398_v10  ;;  %v1651_v45 = vsub.s32 %v448_v34, %v450_v35  ;;  %v1658_v11 = vsub.s32 %v480_v63, %v450_v35 }
  0x15   : > { %1400 = vmatmul.mubr.msk.bf16.vlgmr.msra.gmra.mxu0 %vm203_vm1, %v1573_v15  ;;  %1402 = vmatmul.mubr.msk.bf16.vlgmr.msra.gmra.mxu1 %vm203_vm1, %v1573_v15 }
  0x16   : > { %333 = vmatpush1.bf16.msra.mxu0 %v221_v16  ;;  %376 = vmatpush1.bf16.msra.mxu1 %v227_v17 }
  0x17   : > { %350 = vmatprep.mubr.bf16.mxu0 %v1587_v0  ;;  %393 = vmatprep.mubr.bf16.mxu1 %v1587_v0 }
  0x18   : > { %1460 = vmatprep.subr.bf16.mxu0 %v1588_v18  ;;  %1466 = vmatprep.subr.bf16.mxu1 %v1588_v18 }
  0x1d   : > { %1404 = vmatmul.mubr.msk.bf16.vlgmr.msra.gmra.mxu0 %vm203_vm1, %v1573_v15  ;;  %1406 = vmatmul.mubr.msk.bf16.vlgmr.msra.gmra.mxu1 %vm203_vm1, %v1573_v15 }
  0x1e   : > { %1462 = vmatprep.mubr.msk.bf16.mxu0 %vm1589_vm2, %v1588_v18  ;;  %1468 = vmatprep.mubr.msk.bf16.mxu1 %vm1589_vm2, %v1588_v18 }
  0xd5   : > { %v266_v19 = vpop.f32.mrf.mxu0  ;;  %v309_v20 = vpop.f32.mrf.mxu1 }
  0xd7   : > { %v268_v21 = vpop.f32.mrf.mxu0  ;;  %v311_v22 = vpop.f32.mrf.mxu1 }
  0xd9   : > { %v270_v23 = vpop.f32.mrf.mxu0  ;;  %v313_v24 = vpop.f32.mrf.mxu1 }
  0xda   : > { %v404_v36 = vpack.c.bf16 %v270_v23, %v266_v19  ;;  %v406_v43 = vpack.c.bf16 %v313_v24, %v309_v20  ;;  %v1668_v20 = vld [vmem:[%s1821_s2] sm:$0xff]  }
  0xdb   : > { %v272_v25 = vpop.f32.mrf.mxu0  ;;  %v315_v26 = vpop.f32.mrf.mxu1 }
  0xdc   : > { %v405_v37 = vpack.c.bf16 %v272_v25, %v268_v21  ;;  %v407_v38 = vpack.c.bf16 %v315_v26, %v311_v22  ;;  %v416_v49 = vshrl.u32 %v404_v36, 16  ;;  %v424_v61 = vshrl.u32 %v406_v43, 16 }
  0xdd   : > { %v352_v30 = vpop.f32.mrf.mxu0  ;;  %v395_v31 = vpop.f32.mrf.mxu1 }
  0xde   : > { %v417_v50 = vshrl.u32 %v405_v37, 16  ;;  %v1653_v53 = vpack.i.b16 %v405_v37, %v404_v36  ;;  %v425_v54 = vshrl.u32 %v407_v38, 16  ;;  %v422_v62 = vpack.i.b16 %v407_v38, %v406_v43 }
  0xdf   : > { %v354_v32 = vpop.f32.mrf.mxu0  ;;  %v397_v33 = vpop.f32.mrf.mxu1 }
  0xe0   : > { %v418_v1 = vpack.i.b16 %v417_v50, %v416_v49  ;;  %v426_v5 = vpack.i.b16 %v425_v54, %v424_v61 }
  0xe1   : > { %v356_v39 = vpop.f32.mrf.mxu0  ;;  %v399_v40 = vpop.f32.mrf.mxu1 }
  0xe2   : > { %v408_v41 = vpack.c.bf16 %v356_v39, %v352_v30  ;;  %v410_v42 = vpack.c.bf16 %v399_v40, %v395_v31 }
  0xe3   : > { %v358_v44 = vpop.f32.mrf.mxu0  ;;  %v401_v46 = vpop.f32.mrf.mxu1 }
  0xe4   : > { %v409_v51 = vpack.c.bf16 %v358_v44, %v354_v32  ;;  %v411_v52 = vpack.c.bf16 %v401_v46, %v397_v33  ;;  %v432_v55 = vshrl.u32 %v408_v41, 16  ;;  %v440_v56 = vshrl.u32 %v410_v42, 16 }
  0xe6   : > { %v430_v57 = vpack.i.b16 %v409_v51, %v408_v41  ;;  %v433_v58 = vshrl.u32 %v409_v51, 16  ;;  %v438_v59 = vpack.i.b16 %v411_v52, %v410_v42  ;;  %v441_v60 = vshrl.u32 %v411_v52, 16 }
  0xe8   : > { %v434_v2 = vpack.i.b16 %v433_v58, %v432_v55  ;;  %v444_v3 = vcombine.low %v1653_v53, %v430_v57  ;;  %v442_v4 = vpack.i.b16 %v441_v60, %v440_v56  ;;  %v460_v6 = vcombine.low %v422_v62, %v438_v59 }
  0xe9   : > { %v445_v30 = vcombine.high %v1653_v53, %v430_v57  ;;  %v461_v31 = vcombine.high %v422_v62, %v438_v59 }
  0xea   : > { %v452_v7 = vrot.slane %v444_v3, %v1651_v45  ;;  %v512_v8 = vcombine.low %v418_v1, %v434_v2  ;;  %v468_v9 = vrot.slane %v460_v6, %v1651_v45  ;;  %v528_v10 = vcombine.low %v426_v5, %v442_v4 }
  0xeb   : > { %v513_v33 = vcombine.high %v418_v1, %v434_v2  ;;  %v529_v34 = vcombine.high %v426_v5, %v442_v4  ;;  %v459_v36 = vrot.slane %v445_v30, %v1651_v45  ;;  %v475_v37 = vrot.slane %v461_v31, %v1651_v45 }
  0xec   : > { %v520_v12 = vrot.slane %v512_v8, %v1651_v45  ;;  %v536_v13 = vrot.slane %v528_v10, %v1651_v45  ;;  %v476_v14 = vcombine.low %v452_v7, %v468_v9  ;;  %v477_v25 = vcombine.high %v452_v7, %v468_v9 }
  0xed   : > { %v527_v39 = vrot.slane %v513_v33, %v1651_v45  ;;  %v543_v40 = vrot.slane %v529_v34, %v1651_v45  ;;  %v492_v43 = vcombine.low %v459_v36, %v475_v37  ;;  %v493_v53 = vcombine.high %v459_v36, %v475_v37 }
  0xee   : > { %v484_v15 = vrot.slane %v476_v14, %v1658_v11  ;;  %v544_v16 = vcombine.low %v520_v12, %v536_v13  ;;  %v545_v27 = vcombine.high %v520_v12, %v536_v13  ;;  %v491_v28 = vrot.slane %v477_v25, %v1658_v11 }
  0xef   : > { %v560_v45 = vcombine.low %v527_v39, %v543_v40  ;;  %v500_v46 = vrot.slane %v492_v43, %v1658_v11  ;;  %v561_v55 = vcombine.high %v527_v39, %v543_v40  ;;  %v507_v56 = vrot.slane %v493_v53, %v1658_v11 }
  0xf0   : > { %v591_v17 = vsel %vm207_vm0, %v484_v15, 0  ;;  %v552_v19 = vrot.slane %v544_v16, %v1658_v11  ;;  %v508_v21 = vcombine.high %v484_v15, %v1587_v0  ;;  %v559_v29 = vrot.slane %v545_v27, %v1658_v11 }
  0xf1   : > { %1461 = vmatpush3.bf16.msra.mxu0 %v591_v17  ;;  %v767_v32 = vsel %vm207_vm0, %v491_v28, 0  ;;  %v509_v38 = vcombine.high %v491_v28, %v1587_v0  ;;  %v568_v47 = vrot.slane %v560_v45, %v1658_v11  ;;  %v943_v48 = vsel %vm207_vm0, %v500_v46, 0 }
  0xf2   : > { %v635_v22 = vsel %vm207_vm0, %v552_v19, 0  ;;  %1472 = vmatprep.subr.bf16.mxu0 %v1588_v18  ;;  %v576_v23 = vcombine.high %v552_v19, %v1587_v0  ;;  %v679_v24 = vsel %vm207_vm0, %v508_v21, 0  ;;  %v811_v35 = vsel %vm207_vm0, %v559_v29, 0 }
  0xf3   : > { %1467 = vmatpush3.bf16.msra.mxu1 %v635_v22  ;;  %v577_v41 = vcombine.high %v559_v29, %v1587_v0  ;;  %v855_v42 = vsel %vm207_vm0, %v509_v38, 0  ;;  %v987_v49 = vsel %vm207_vm0, %v568_v47, 0  ;;  %v510_v50 = vcombine.high %v500_v46, %v1587_v0 }
  0xf4   : > { %1463 = vmatmul.mubr.msk.bf16.vlgmr.msra.gmra.mxu0 %vm203_vm1, %v1668_v20  ;;  %1478 = vmatprep.subr.bf16.mxu1 %v1588_v18  ;;  %v723_v26 = vsel %vm207_vm0, %v576_v23, 0  ;;  %v578_v51 = vcombine.high %v568_v47, %v1587_v0  ;;  %v575_v57 = vrot.slane %v561_v55, %v1658_v11  ;;  %v1119_v58 = vsel %vm207_vm0, %v507_v56, 0 }
  0xf5   : > { %1473 = vmatpush3.bf16.msra.mxu0 %v679_v24  ;;  %1474 = vmatprep.mubr.msk.bf16.mxu0 %vm1589_vm2, %v1588_v18  ;;  %v899_v44 = vsel %vm207_vm0, %v577_v41, 0  ;;  %v1031_v52 = vsel %vm207_vm0, %v510_v50, 0  ;;  %v511_v60 = vcombine.high %v507_v56, %v1587_v0 }
  0xf6   : > { %1469 = vmatmul.mubr.msk.bf16.vlgmr.msra.gmra.mxu1 %vm203_vm1, %v1668_v20  ;;  %1484 = vmatprep.subr.bf16.mxu0 %v1588_v18  ;;  %v1075_v54 = vsel %vm207_vm0, %v578_v51, 0  ;;  %v1163_v59 = vsel %vm207_vm0, %v575_v57, 0  ;;  %v579_v61 = vcombine.high %v575_v57, %v1587_v0 }
  0xf7   : > { %1479 = vmatpush3.bf16.msra.mxu1 %v723_v26  ;;  %1480 = vmatprep.mubr.msk.bf16.mxu1 %vm1589_vm2, %v1588_v18  ;;  %v1207_v62 = vsel %vm207_vm0, %v511_v60, 0 }
  0xf8   : > { %1490 = vmatprep.subr.bf16.mxu1 %v1588_v18  ;;  %v1251_v63 = vsel %vm207_vm0, %v579_v61, 0 }
  0xfc   : > { %1475 = vmatmul.mubr.msk.bf16.vlgmr.msra.gmra.mxu0 %vm203_vm1, %v1668_v20 }
  0xfd   : > { %1485 = vmatpush3.bf16.msra.mxu0 %v767_v32  ;;  %1486 = vmatprep.mubr.msk.bf16.mxu0 %vm1589_vm2, %v1588_v18 }
  0xfe   : > { %1481 = vmatmul.mubr.msk.bf16.vlgmr.msra.gmra.mxu1 %vm203_vm1, %v1668_v20  ;;  %1496 = vmatprep.subr.bf16.mxu0 %v1588_v18 }
  0xff   : > { %1491 = vmatpush3.bf16.msra.mxu1 %v811_v35  ;;  %1492 = vmatprep.mubr.msk.bf16.mxu1 %vm1589_vm2, %v1588_v18 }
 0x100   : > { %1502 = vmatprep.subr.bf16.mxu1 %v1588_v18 }
 0x104   : > { %1487 = vmatmul.mubr.msk.bf16.vlgmr.msra.gmra.mxu0 %vm203_vm1, %v1668_v20 }
 0x105   : > { %1497 = vmatpush3.bf16.msra.mxu0 %v855_v42  ;;  %1498 = vmatprep.mubr.msk.bf16.mxu0 %vm1589_vm2, %v1588_v18 }
 0x106   : > { %1493 = vmatmul.mubr.msk.bf16.vlgmr.msra.gmra.mxu1 %vm203_vm1, %v1668_v20  ;;  %1508 = vmatprep.subr.bf16.mxu0 %v1588_v18 }
 0x107   : > { %1503 = vmatpush3.bf16.msra.mxu1 %v899_v44  ;;  %1504 = vmatprep.mubr.msk.bf16.mxu1 %vm1589_vm2, %v1588_v18 }
 0x108   : > { %1514 = vmatprep.subr.bf16.mxu1 %v1588_v18 }
 0x10c   : > { %1499 = vmatmul.mubr.msk.bf16.vlgmr.msra.gmra.mxu0 %vm203_vm1, %v1668_v20 }
 0x10d   : > { %1509 = vmatpush3.bf16.msra.mxu0 %v943_v48  ;;  %1510 = vmatprep.mubr.msk.bf16.mxu0 %vm1589_vm2, %v1588_v18 }
 0x10e   : > { %1505 = vmatmul.mubr.msk.bf16.vlgmr.msra.gmra.mxu1 %vm203_vm1, %v1668_v20  ;;  %1520 = vmatprep.subr.bf16.mxu0 %v1588_v18 }
 0x10f   : > { %1515 = vmatpush3.bf16.msra.mxu1 %v987_v49  ;;  %1516 = vmatprep.mubr.msk.bf16.mxu1 %vm1589_vm2, %v1588_v18 }
 0x110   : > { %1526 = vmatprep.subr.bf16.mxu1 %v1588_v18 }
 0x114   : > { %1511 = vmatmul.mubr.msk.bf16.vlgmr.msra.gmra.mxu0 %vm203_vm1, %v1668_v20 }
 0x115   : > { %1521 = vmatpush3.bf16.msra.mxu0 %v1031_v52  ;;  %1522 = vmatprep.mubr.msk.bf16.mxu0 %vm1589_vm2, %v1588_v18 }
 0x116   : > { %1517 = vmatmul.mubr.msk.bf16.vlgmr.msra.gmra.mxu1 %vm203_vm1, %v1668_v20  ;;  %1532 = vmatprep.subr.bf16.mxu0 %v1588_v18 }
 0x117   : > { %1527 = vmatpush3.bf16.msra.mxu1 %v1075_v54  ;;  %1528 = vmatprep.mubr.msk.bf16.mxu1 %vm1589_vm2, %v1588_v18 }
 0x118   : > { %1538 = vmatprep.subr.bf16.mxu1 %v1588_v18 }
 0x11c   : > { %1523 = vmatmul.mubr.msk.bf16.vlgmr.msra.gmra.mxu0 %vm203_vm1, %v1668_v20 }
 0x11d   : > { %1533 = vmatpush3.bf16.msra.mxu0 %v1119_v58  ;;  %1534 = vmatprep.mubr.msk.bf16.mxu0 %vm1589_vm2, %v1588_v18 }
 0x11e   : > { %1529 = vmatmul.mubr.msk.bf16.vlgmr.msra.gmra.mxu1 %vm203_vm1, %v1668_v20  ;;  %1544 = vmatprep.subr.bf16.mxu0 %v1588_v18 }
 0x11f   : > { %1539 = vmatpush3.bf16.msra.mxu1 %v1163_v59  ;;  %1540 = vmatprep.mubr.msk.bf16.mxu1 %vm1589_vm2, %v1588_v18 }
 0x120   : > { %1550 = vmatprep.subr.bf16.mxu1 %v1588_v18 }
 0x124   : > { %1535 = vmatmul.mubr.msk.bf16.vlgmr.msra.gmra.mxu0 %vm203_vm1, %v1668_v20 }
 0x125   : > { %1545 = vmatpush3.bf16.msra.mxu0 %v1207_v62  ;;  %1546 = vmatprep.mubr.msk.bf16.mxu0 %vm1589_vm2, %v1588_v18 }
 0x126   : > { %1541 = vmatmul.mubr.msk.bf16.vlgmr.msra.gmra.mxu1 %vm203_vm1, %v1668_v20 }
 0x127   : > { %1551 = vmatpush3.bf16.msra.mxu1 %v1251_v63  ;;  %1552 = vmatprep.mubr.msk.bf16.mxu1 %vm1589_vm2, %v1588_v18 }
 0x12c   : > { %1547 = vmatmul.mubr.msk.bf16.vlgmr.msra.gmra.mxu0 %vm203_vm1, %v1668_v20 }
 0x12e   : > { %1553 = vmatmul.mubr.msk.bf16.vlgmr.msra.gmra.mxu1 %vm203_vm1, %v1668_v20 }
 0x1b4   : > { %v627_v0 = vpop.f32.mrf.mxu0 }
 0x1b5   : > { %1294 = vst [vmem:[%s1782_s25] sm:$0xff] %v627_v0 }
 0x1b6   : > { %v671_v18 = vpop.f32.mrf.mxu1  ;;  %v1464_v1 = vpop.f32.mrf.mxu0 }
 0x1b7   : > { %1296 = vst [vmem:[%s1782_s25 + $0x10] sm:$0xff] %v671_v18 }
 0x1b8   : > { %v1470_v2 = vpop.f32.mrf.mxu1  ;;  %v630_v3 = vpop.f32.mrf.mxu0 }
 0x1b9   : > { %1295 = vst [vmem:[%s1782_s25 + $0x8] sm:$0xff] %v630_v3 }
 0x1ba   : > { %v674_v4 = vpop.f32.mrf.mxu1  ;;  %v1465_v5 = vpop.f32.mrf.mxu0 }
 0x1bb   : > { %1297 = vst [vmem:[%s1782_s25 + $0x18] sm:$0xff] %v674_v4 }
 0x1bc   : > { %v1471_v6 = vpop.f32.mrf.mxu1  ;;  %v715_v7 = vpop.f32.mrf.mxu0 }
 0x1bd   : > { %1298 = vst [vmem:[%s1782_s25 + $0x20] sm:$0xff] %v715_v7 }
 0x1be   : > { %v759_v8 = vpop.f32.mrf.mxu1  ;;  %v1476_v9 = vpop.f32.mrf.mxu0 }
 0x1bf   : > { %1300 = vst [vmem:[%s1782_s25 + $0x30] sm:$0xff] %v759_v8 }
 0x1c0   : > { %v1482_v10 = vpop.f32.mrf.mxu1  ;;  %v718_v11 = vpop.f32.mrf.mxu0 }
 0x1c1   : > { %1299 = vst [vmem:[%s1782_s25 + $0x28] sm:$0xff] %v718_v11 }
 0x1c2   : > { %v762_v12 = vpop.f32.mrf.mxu1  ;;  %v1477_v13 = vpop.f32.mrf.mxu0 }
 0x1c3   : > { %1301 = vst [vmem:[%s1782_s25 + $0x38] sm:$0xff] %v762_v12 }
 0x1c4   : > { %v1483_v14 = vpop.f32.mrf.mxu1  ;;  %v803_v15 = vpop.f32.mrf.mxu0 }
 0x1c5   : > { %1302 = vst [vmem:[%s1782_s25 + $0x40] sm:$0xff] %v803_v15 }
 0x1c6   : > { %v847_v16 = vpop.f32.mrf.mxu1  ;;  %v1488_v17 = vpop.f32.mrf.mxu0 }
 0x1c7   : > { %1304 = vst [vmem:[%s1782_s25 + $0x50] sm:$0xff] %v847_v16 }
 0x1c8   : > { %v1494_v19 = vpop.f32.mrf.mxu1  ;;  %v806_v20 = vpop.f32.mrf.mxu0 }
 0x1c9   : > { %1303 = vst [vmem:[%s1782_s25 + $0x48] sm:$0xff] %v806_v20 }
 0x1ca   : > { %v850_v21 = vpop.f32.mrf.mxu1  ;;  %v1489_v22 = vpop.f32.mrf.mxu0 }
 0x1cb   : > { %1305 = vst [vmem:[%s1782_s25 + $0x58] sm:$0xff] %v850_v21 }
 0x1cc   : > { %v1495_v23 = vpop.f32.mrf.mxu1  ;;  %v891_v24 = vpop.f32.mrf.mxu0 }
 0x1cd   : > { %1306 = vst [vmem:[%s1782_s25 + $0x60] sm:$0xff] %v891_v24 }
 0x1ce   : > { %v935_v25 = vpop.f32.mrf.mxu1  ;;  %v1500_v26 = vpop.f32.mrf.mxu0 }
 0x1cf   : > { %1308 = vst [vmem:[%s1782_s25 + $0x70] sm:$0xff] %v935_v25 }
 0x1d0   : > { %v1506_v27 = vpop.f32.mrf.mxu1  ;;  %v894_v28 = vpop.f32.mrf.mxu0 }
 0x1d1   : > { %1307 = vst [vmem:[%s1782_s25 + $0x68] sm:$0xff] %v894_v28 }
 0x1d2   : > { %v938_v29 = vpop.f32.mrf.mxu1  ;;  %v1501_v30 = vpop.f32.mrf.mxu0 }
 0x1d3   : > { %1309 = vst [vmem:[%s1782_s25 + $0x78] sm:$0xff] %v938_v29 }
 0x1d4   : > { %v1507_v31 = vpop.f32.mrf.mxu1  ;;  %v979_v32 = vpop.f32.mrf.mxu0 }
 0x1d5   : > { %1310 = vst [vmem:[%s1782_s25 + $0x80] sm:$0xff] %v979_v32 }
 0x1d6   : > { %v1023_v33 = vpop.f32.mrf.mxu1  ;;  %v1512_v34 = vpop.f32.mrf.mxu0 }
 0x1d7   : > { %1312 = vst [vmem:[%s1782_s25 + $0x90] sm:$0xff] %v1023_v33 }
 0x1d8   : > { %v1518_v35 = vpop.f32.mrf.mxu1  ;;  %v982_v36 = vpop.f32.mrf.mxu0 }
 0x1d9   : > { %1311 = vst [vmem:[%s1782_s25 + $0x88] sm:$0xff] %v982_v36 }
 0x1da   : > { %v1026_v37 = vpop.f32.mrf.mxu1  ;;  %v1513_v38 = vpop.f32.mrf.mxu0 }
 0x1db   : > { %1313 = vst [vmem:[%s1782_s25 + $0x98] sm:$0xff] %v1026_v37 }
 0x1dc   : > { %v1519_v39 = vpop.f32.mrf.mxu1  ;;  %v1067_v40 = vpop.f32.mrf.mxu0 }
 0x1dd   : > { %1314 = vst [vmem:[%s1782_s25 + $0xa0] sm:$0xff] %v1067_v40 }
 0x1de   : > { %v1111_v41 = vpop.f32.mrf.mxu1  ;;  %v1524_v42 = vpop.f32.mrf.mxu0 }
 0x1df   : > { %1316 = vst [vmem:[%s1782_s25 + $0xb0] sm:$0xff] %v1111_v41 }
 0x1e0   : > { %v1530_v43 = vpop.f32.mrf.mxu1  ;;  %v1070_v44 = vpop.f32.mrf.mxu0 }
 0x1e1   : > { %1315 = vst [vmem:[%s1782_s25 + $0xa8] sm:$0xff] %v1070_v44 }
 0x1e2   : > { %v1114_v45 = vpop.f32.mrf.mxu1  ;;  %v1525_v46 = vpop.f32.mrf.mxu0 }
 0x1e3   : > { %1317 = vst [vmem:[%s1782_s25 + $0xb8] sm:$0xff] %v1114_v45 }
 0x1e4   : > { %v1531_v47 = vpop.f32.mrf.mxu1  ;;  %v1155_v48 = vpop.f32.mrf.mxu0 }
 0x1e5   : > { %1318 = vst [vmem:[%s1782_s25 + $0xc0] sm:$0xff] %v1155_v48 }
 0x1e6   : > { %v1199_v49 = vpop.f32.mrf.mxu1  ;;  %v1536_v50 = vpop.f32.mrf.mxu0 }
 0x1e7   : > { %1320 = vst [vmem:[%s1782_s25 + $0xd0] sm:$0xff] %v1199_v49 }
 0x1e8   : > { %v1542_v51 = vpop.f32.mrf.mxu1  ;;  %v1158_v52 = vpop.f32.mrf.mxu0 }
 0x1e9   : > { %1319 = vst [vmem:[%s1782_s25 + $0xc8] sm:$0xff] %v1158_v52 }
 0x1ea   : > { %v1202_v53 = vpop.f32.mrf.mxu1  ;;  %v1537_v54 = vpop.f32.mrf.mxu0 }
 0x1eb   : > { %1321 = vst [vmem:[%s1782_s25 + $0xd8] sm:$0xff] %v1202_v53 }
 0x1ec   : > { %v1543_v55 = vpop.f32.mrf.mxu1  ;;  %v1243_v56 = vpop.f32.mrf.mxu0 }
 0x1ed   : > { %1322 = vst [vmem:[%s1782_s25 + $0xe0] sm:$0xff] %v1243_v56 }
 0x1ee   : > { %v1287_v57 = vpop.f32.mrf.mxu1  ;;  %v1548_v58 = vpop.f32.mrf.mxu0 }
 0x1ef   : > { %1324 = vst [vmem:[%s1782_s25 + $0xf0] sm:$0xff] %v1287_v57 }
 0x1f0   : > { %v1554_v59 = vpop.f32.mrf.mxu1  ;;  %v1246_v60 = vpop.f32.mrf.mxu0 }
 0x1f1   : > { %1323 = vst [vmem:[%s1782_s25 + $0xe8] sm:$0xff] %v1246_v60 }
 0x1f2   : > { %v1290_v61 = vpop.f32.mrf.mxu1  ;;  %v1549_v62 = vpop.f32.mrf.mxu0 }
 0x1f3   : > { %1325 = vst [vmem:[%s1782_s25 + $0xf8] sm:$0xff] %v1290_v61 }
 0x1f4   : > { %v1555_v63 = vpop.f32.mrf.mxu1 }
 0x1f5 PF: > { %s13_s12 = sadd.s32 1, %s1585_s12  }
 0x1f6   : > { %p10_p4 = scmp.ge.s32.totalorder %s13_s12, 4  }
 0x1f8   :  { %12 = sbr.rel (!%p10_p4) target bundleno = 1 (0x1), region = 62 }

// kernel: contrastive_segmentation_forward.4
= control target key start
LH: loop header
LB: loop body
LE: loop exit
PB: predicated region body
PF: predicated region fallthrough
CT: control target
= control target key end

     0   :  { %s2462_s18 = smov 0   ;;  %s2464_s19 = smov 0   ;;  %s2996_s0 = inlined_call_operand.vmem [shape: bf16[2,10,10,128], index: 0, kind: input, shape index: {}]   ;;  %s2997_s1 = inlined_call_operand.vmem [shape: bf16[3,384,128], index: 1, kind: input, shape index: {}]   ;;  %s2998_s2 = inlined_call_operand.vmem [shape: f32[1,128], index: 2, kind: input, shape index: {}]   ;;  %s2999_s3 = inlined_call_operand.vmem [shape: bf16[128,128], index: 3, kind: input, shape index: {}]   ;;  %s3000_s4 = inlined_call_operand.vmem [shape: f32[1,128], index: 4, kind: input, shape index: {}]   ;;  %s3001_s5 = inlined_call_operand.vmem [shape: bf16[2,64,128], index: 5, kind: output, shape index: {}]  }
   0x1   :  { %s2466_s20 = smov 0  }
   0x2 LB: > { %s27_s21 = sadd.s32 1, %s2426_s19  ;;  %p1743_p0 = scmp.ge.s32.totalorder %s2430_s20, 1  ;;  %s2430_s20 = sphi %s2466_s20, %s15_s20   ;;  %s2426_s19 = sphi %s2464_s19, %s3003_s19   ;;  %s2422_s18 = sphi %s2462_s18, %s3002_s18  }
   0x3   : > { %p29_p1 = scmp.ge.s32.totalorder %s27_s21, 2  ;;  %p201_p2 = scmp.lt.s32.totalorder %s2430_s20, 3 }
   0x5   : > { %s3005_s21 = smov (%p29_p1, %s27_s21), 0  ;;  %p202_p3 = pnand %p1743_p0, %p201_p2 }
   0x6   : > { %p233_p4 = scmp.lt.s32.totalorder (!%p202_p3), %s2422_s18, 1 }
   0x7   : > { %205 = sbr.rel (%p202_p3) target bundleno = 548 (0x224), region = 40 }
   0xc   : > { %v2309_v0 = vld [vmem:[%s2997_s1 + $0x138] sm:$0xff]   ;;  %v2312_v3 = vld [vmem:[%s2997_s1 + $0x130] sm:$0xff]   ;;  %v2315_v6 = vld [vmem:[%s2997_s1 + $0x128] sm:$0xff]   ;;  %s3007_s18 = smov (!%p233_p4, %s2422_s18), 1 }
   0xd   : > { %v2310_v1 = vld [vmem:[%s2997_s1 + $0xf8] sm:$0xff]   ;;  %2004 = vmatprep.subr.bf16.mxu0 %v2309_v0  ;;  %v2313_v4 = vld [vmem:[%s2997_s1 + $0xf0] sm:$0xff]   ;;  %v2316_v7 = vld [vmem:[%s2997_s1 + $0xe8] sm:$0xff]   ;;  %s2284_s8 = smul.u32 80, %s3007_s18  ;;  %s1972_s27 = sshll.u32 %s3007_s18, 5 }
   0xe   : > { %v2311_v2 = vld [vmem:[%s2997_s1 + $0x178] sm:$0xff]   ;;  %2005 = vmatpush3.bf16.msra.mxu0 %v2310_v1  ;;  %v2314_v5 = vld [vmem:[%s2997_s1 + $0x170] sm:$0xff]   ;;  %v2317_v8 = vld [vmem:[%s2997_s1 + $0x168] sm:$0xff]   ;;  %s246_s29 = scalar_lea.vmem %s3001_s5, %s1972_s27 }
   0xf   : > { %2172 = vmatprep.subr.bf16.mxu1 %v2311_v2  ;;  %2006 = vmatprep.subr.bf16.mxu0 %v2312_v3  ;;  %v2318_v9 = vld [vmem:[%s2997_s1 + $0x120] sm:$0xff]   ;;  %v2321_v12 = vld [vmem:[%s2997_s1 + $0x118] sm:$0xff]   ;;  %v2324_v15 = vld [vmem:[%s2997_s1 + $0x110] sm:$0xff]   ;;  %s2550_s23 = scalar_lea.vmem %s2996_s0, %s2284_s8 }
  0x10   : > { %2173 = vmatpush3.bf16.msra.mxu1 %v2311_v2  ;;  %v2319_v10 = vld [vmem:[%s2997_s1 + $0xe0] sm:$0xff]   ;;  %v2323_v13 = vld [vmem:[%s2997_s1 + $0x158] sm:$0xff]   ;;  %v2326_v16 = vld [vmem:[%s2997_s1 + $0x150] sm:$0xff]  }
  0x11   : > { %2174 = vmatprep.subr.bf16.mxu1 %v2314_v5  ;;  %v2320_v11 = vld [vmem:[%s2997_s1 + $0x160] sm:$0xff]   ;;  %v2322_v14 = vld [vmem:[%s2997_s1 + $0xd8] sm:$0xff]   ;;  %v2325_v17 = vld [vmem:[%s2997_s1 + $0xd0] sm:$0xff]  }
  0x12   : > { %2007 = vmatpush3.bf16.msra.mxu0 %v2313_v4  ;;  %v2327_v18 = vld [vmem:[%s2997_s1 + $0x108] sm:$0xff]   ;;  %v2330_v21 = vld [vmem:[%s2997_s1 + $0x100] sm:$0xff]   ;;  %v2563_v24 = vld [vmem:[%s2550_s23 + $0x10] sm:$0xf] }
  0x13   : > { %2008 = vmatprep.subr.bf16.mxu0 %v2315_v6  ;;  %v2328_v19 = vld [vmem:[%s2997_s1 + $0xc8] sm:$0xff]   ;;  %v258_v25 = vld [vmem:[%s2550_s23 + $0x14] sm:$0x1]  ;;  %v2332_v27 = vld [vmem:[%s2997_s1 + $0x140] sm:$0xff]  }
  0x14   : > { %2175 = vmatpush3.bf16.msra.mxu1 %v2314_v5  ;;  %v2329_v20 = vld [vmem:[%s2997_s1 + $0x148] sm:$0xff]   ;;  %v2573_v28 = vcombine.low %v2563_v24, %v258_v25  ;;  %v2576_v29 = vld [vmem:[%s2550_s23 + $0x18] sm:$0xf]  ;;  %v260_v30 = vld [vmem:[%s2550_s23 + $0x1c] sm:$0x1] }
  0x15   : > { %2176 = vmatprep.subr.bf16.mxu1 %v2317_v8  ;;  %v2559_v22 = vld [vmem:[%s2550_s23 + $0x8] sm:$0xf]  ;;  %v256_v23 = vld [vmem:[%s2550_s23 + $0xc] sm:$0x1]  ;;  %v2331_v31 = vld [vmem:[%s2997_s1 + $0xc0] sm:$0xff]   ;;  %v2585_v34 = vcombine.low %v2576_v29, %v260_v30 }
  0x16   : > { %2009 = vmatpush3.bf16.msra.mxu0 %v2316_v7  ;;  %v2567_v26 = vcombine.low %v2559_v22, %v256_v23  ;;  %v328_v36 = vshrl.u32 %v2573_v28, 16  ;;  %v330_v37 = vshll.u32 %v2573_v28, 16  ;;  %v2336_v38 = vld [vmem:[%s2997_s1 + $0x78] sm:$0xff]   ;;  %v371_v39 = vrot.slane %v2573_v28, 1  ;;  %v2595_v41 = vld [vmem:[%s2550_s23 + $0x20] sm:$0xf] }
  0x17   : > { %2010 = vmatprep.subr.bf16.mxu0 %v2318_v9  ;;  %v262_v42 = vld [vmem:[%s2550_s23 + $0x24] sm:$0x1]  ;;  %v2340_v43 = vld [vmem:[%s2997_s1 + $0xb8] sm:$0xff]   ;;  %v372_v45 = vrot.slane %v2585_v34, 1  ;;  %v1804_v51 = vcombine.low %v2559_v22, %v2563_v24  ;;  %v2343_v53 = vld [vmem:[%s2997_s1 + $0xb0] sm:$0xff]   ;;  %v335_v54 = vshrl.u32 %v2585_v34, 16  ;;  %v1807_v9 = vcombine.low %v2576_v29, %v2595_v41 }
  0x18   : > { %2177 = vmatpush3.bf16.msra.mxu1 %v2317_v8  ;;  %v321_v32 = vshrl.u32 %v2567_v26, 16  ;;  %v323_v33 = vshll.u32 %v2567_v26, 16  ;;  %v370_v35 = vrot.slane %v2567_v26, 1  ;;  %v332_v44 = vrot.slane %v330_v37, 1  ;;  %v2338_v52 = vld [vmem:[%s2997_s1 + $0x38] sm:$0xff]   ;;  %v2341_v60 = vld [vmem:[%s2997_s1 + $0x70] sm:$0xff]  }
  0x19   : > { %2178 = vmatprep.subr.bf16.mxu1 %v2320_v11  ;;  %v2607_v47 = vcombine.low %v2595_v41, %v262_v42  ;;  %v337_v55 = vshll.u32 %v2585_v34, 16  ;;  %v2342_v63 = vld [vmem:[%s2997_s1 + $0x30] sm:$0xff]   ;;  %v2345_v2 = vld [vmem:[%s2997_s1 + $0x68] sm:$0xff]   ;;  %v268_v23 = vld [vmem:[%s2550_s23 + $0x3c] sm:$0x1] }
  0x1a   : > { %2011 = vmatpush3.bf16.msra.mxu0 %v2319_v10  ;;  %v325_v40 = vrot.slane %v323_v33, 1  ;;  %v1806_v46 = vcombine.low %v370_v35, %v371_v39  ;;  %v2611_v49 = vor.u32 %v332_v44, %v328_v36  ;;  %v2347_v3 = vld [vmem:[%s2997_s1 + $0xa8] sm:$0xff]   ;;  %v2658_v8 = vld [vmem:[%s2550_s23 + $0x30] sm:$0xf]  ;;  %v266_v10 = vld [vmem:[%s2550_s23 + $0x34] sm:$0x1] }
  0x1b   : > { %2012 = vmatprep.subr.bf16.mxu0 %v2321_v12  ;;  %v373_v50 = vrot.slane %v2607_v47, 1  ;;  %v342_v58 = vshrl.u32 %v2607_v47, 16  ;;  %v344_v59 = vshll.u32 %v2607_v47, 16  ;;  %v339_v61 = vrot.slane %v337_v55, 1  ;;  %v2346_v5 = vld [vmem:[%s2997_s1 + $0x28] sm:$0xff]   ;;  %v2350_v12 = vld [vmem:[%s2997_s1 + $0xa0] sm:$0xff]  }
  0x1c   : > { %2179 = vmatpush3.bf16.msra.mxu1 %v2320_v11  ;;  %v2609_v48 = vor.u32 %v325_v40, %v321_v32  ;;  %2188 = vmatprep.mubr.bf16.mxu1 %v1806_v46  ;;  %v2654_v6 = vld [vmem:[%s2550_s23 + $0x28] sm:$0xf]  ;;  %v264_v7 = vld [vmem:[%s2550_s23 + $0x2c] sm:$0x1]  ;;  %v2349_v25 = vld [vmem:[%s2997_s1 + $0x20] sm:$0xff]  }
  0x1d   : > { %2180 = vmatprep.subr.bf16.mxu1 %v2323_v13  ;;  %v1809_v57 = vcombine.low %v372_v45, %v373_v50  ;;  %v346_v62 = vrot.slane %v344_v59, 1  ;;  %v2638_v0 = vor.u32 %v339_v61, %v335_v54  ;;  %v2664_v11 = vcombine.low %v2654_v6, %v264_v7  ;;  %v2689_v30 = vld [vmem:[%s2550_s23 + $0x40] sm:$0xf]  ;;  %v2354_v42 = vld [vmem:[%s2997_s1 + $0x58] sm:$0xff]   ;;  %v2374_v28 = vld [vmem:[%s2997_s1 + $0x1f0] sm:$0xff]  }
  0x1e   : > { %2013 = vmatpush3.bf16.msra.mxu0 %v2322_v14  ;;  %v1805_v56 = vcombine.low %v2609_v48, %v2611_v49  ;;  %v2348_v14 = vld [vmem:[%s2997_s1 + $0x60] sm:$0xff]   ;;  %v2355_v46 = vld [vmem:[%s2997_s1 + $0x18] sm:$0xff]   ;;  %v2378_v47 = vld [vmem:[%s2997_s1 + $0x1e8] sm:$0xff]  }
  0x1f   : > { %2014 = vmatprep.subr.bf16.mxu0 %v2324_v15  ;;  %v2640_v1 = vor.u32 %v346_v62, %v342_v58  ;;  %v349_v15 = vshrl.u32 %v2664_v11, 16  ;;  %v2791_v34 = vcombine.low %v2611_v49, %v2638_v0  ;;  %v1843_v49 = vcombine.low %v2563_v24, %v2576_v29  ;;  %v2382_v24 = vld [vmem:[%s2997_s1 + $0x1a0] sm:$0xff]   ;;  %v2387_v29 = vld [vmem:[%s2997_s1 + $0x218] sm:$0xff]  }
  0x20   : > { %2181 = vmatpush3.bf16.msra.mxu1 %v2323_v13  ;;  %705 = vmatprep.mubr.bf16.mxu0 %v1805_v56  ;;  %v2670_v13 = vcombine.low %v2658_v8, %v266_v10  ;;  %v254_v10 = vld [vmem:[%s2550_s23 + $0x4] sm:$0x1] }
  0x21   : > { %2182 = vmatprep.subr.bf16.mxu1 %v2326_v16  ;;  %v1808_v4 = vcombine.low %v2638_v0, %v2640_v1  ;;  %v2383_v0 = vld [vmem:[%s2997_s1 + $0x220] sm:$0xff]  }
  0x22   : > { %2015 = vmatpush3.bf16.msra.mxu0 %v2325_v17  ;;  %v374_v17 = vrot.slane %v2664_v11, 1 }
  0x23   : > { %2016 = vmatprep.subr.bf16.mxu0 %v2327_v18  ;;  %v2679_v18 = vld [vmem:[%s2550_s23 + $0x38] sm:$0xf] }
  0x24   : > { %2183 = vmatpush3.bf16.msra.mxu1 %v2326_v16  ;;  %v351_v16 = vshll.u32 %v2664_v11, 16  ;;  %v2693_v32 = vcombine.low %v2679_v18, %v268_v23  ;;  %v2381_v11 = vld [vmem:[%s2997_s1 + $0x1e0] sm:$0xff]  }
  0x25   : > { %2184 = vmatprep.subr.bf16.mxu1 %v2329_v20 }
  0x26   : > { %2017 = vmatpush3.bf16.msra.mxu0 %v2328_v19  ;;  %v356_v19 = vshrl.u32 %v2670_v13, 16  ;;  %v363_v54 = vshrl.u32 %v2693_v32, 16  ;;  %v365_v55 = vshll.u32 %v2693_v32, 16 }
  0x27   : > { %2018 = vmatprep.subr.bf16.mxu0 %v2330_v21  ;;  %v375_v21 = vrot.slane %v2670_v13, 1 }
  0x28   : > { %2185 = vmatpush3.bf16.msra.mxu1 %v2329_v20  ;;  %v358_v20 = vshll.u32 %v2670_v13, 16  ;;  %v367_v61 = vrot.slane %v365_v55, 1 }
  0x29   : > { %2186 = vmatprep.subr.bf16.mxu1 %v2332_v27  ;;  %v1812_v36 = vcombine.low %v374_v17, %v375_v21 }
  0x2a   : > { %2019 = vmatpush3.bf16.msra.mxu0 %v2331_v31  ;;  %v270_v31 = vld [vmem:[%s2550_s23 + $0x44] sm:$0x1]  ;;  %v360_v33 = vrot.slane %v358_v20, 1 }
  0x2b   : > { %2056 = vmatprep.subr.bf16.mxu0 %v2336_v38  ;;  %v2700_v37 = vcombine.low %v2689_v30, %v270_v31  ;;  %v2358_v38 = vld [vmem:[%s2997_s1 + $0x98] sm:$0xff]  }
  0x2c   : > { %2187 = vmatpush3.bf16.msra.mxu1 %v2332_v27  ;;  %v353_v27 = vrot.slane %v351_v16, 1  ;;  %v2711_v44 = vor.u32 %v360_v33, %v356_v19  ;;  %v2368_v16 = vld [vmem:[%s2997_s1 + $0x80] sm:$0xff]  }
  0x2d   : > { %2196 = vmatprep.subr.bf16.mxu1 %v2340_v43  ;;  %706 = vmatmul.mubr.bf16.vlgmr.msra.gmra.mxu0 %v1804_v51  ;;  %v453_v51 = vrot.slane %v2700_v37, 1  ;;  %v447_v58 = vshrl.u32 %v2700_v37, 16  ;;  %v449_v59 = vshll.u32 %v2700_v37, 16  ;;  %v2366_v19 = vld [vmem:[%s2997_s1 + $0x40] sm:$0xff]   ;;  %v2401_v37 = vld [vmem:[%s2999_s3 + $0x30] sm:$0xff]  }
  0x2e   : > { %2057 = vmatpush3.bf16.msra.mxu0 %v2338_v52  ;;  %713 = vmatprep.mubr.bf16.mxu0 %v1808_v4  ;;  %v2705_v40 = vor.u32 %v353_v27, %v349_v15  ;;  %v2361_v52 = vld [vmem:[%s2997_s1 + $0x90] sm:$0xff]   ;;  %v2363_v4 = vld [vmem:[%s2997_s1 + $0x48] sm:$0xff]   ;;  %v2367_v27 = vld [vmem:[%s2997_s1] sm:$0xff]  }
  0x2f   : > { %2189 = vmatmul.mubr.bf16.vlgmr.msra.gmra.mxu1 %v1809_v57  ;;  %2058 = vmatprep.subr.bf16.mxu0 %v2341_v60  ;;  %v2359_v60 = vld [vmem:[%s2997_s1 + $0x50] sm:$0xff]   ;;  %v451_v62 = vrot.slane %v449_v59, 1  ;;  %v272_v59 = vld [vmem:[%s2550_s23 + $0x4c] sm:$0x1] }
  0x30   : > { %2197 = vmatpush3.bf16.msra.mxu1 %v2340_v43  ;;  %v376_v43 = vrot.slane %v2693_v32, 1  ;;  %2192 = vmatprep.mubr.bf16.mxu1 %v1812_v36  ;;  %v1811_v56 = vcombine.low %v2705_v40, %v2711_v44  ;;  %v2373_v36 = vld [vmem:[%s2997_s1 + $0x238] sm:$0xff]   ;;  %v1847_v13 = vcombine.low %v2640_v1, %v2705_v40  ;;  %v2388_v32 = vld [vmem:[%s2997_s1 + $0x1d0] sm:$0xff]  }
  0x31   : > { %2198 = vmatprep.subr.bf16.mxu1 %v2343_v53  ;;  %v2385_v1 = vld [vmem:[%s2997_s1 + $0x1d8] sm:$0xff]   ;;  %v2390_v40 = vld [vmem:[%s2997_s1 + $0x210] sm:$0xff]  }
  0x32   : > { %2059 = vmatpush3.bf16.msra.mxu0 %v2342_v63  ;;  %v1815_v57 = vcombine.low %v376_v43, %v453_v51  ;;  %v2360_v63 = vld [vmem:[%s2997_s1 + $0x10] sm:$0xff]  }
  0x33   : > { %2060 = vmatprep.subr.bf16.mxu0 %v2345_v2  ;;  %v2738_v2 = vor.u32 %v367_v61, %v363_v54 }
  0x34   : > { %2199 = vmatpush3.bf16.msra.mxu1 %v2343_v53  ;;  %v1810_v53 = vcombine.low %v2654_v6, %v2658_v8 }
  0x35   : > { %2200 = vmatprep.subr.bf16.mxu1 %v2347_v3  ;;  %714 = vmatmul.mubr.bf16.gmra.mxu0 %v1807_v9  ;;  %v253_v9 = vld [vmem:[%s2550_s23] sm:$0xf]  ;;  %v1850_v55 = vcombine.low %v2711_v44, %v2738_v2  ;;  %v1849_v44 = vcombine.low %v2658_v8, %v2679_v18 }
  0x36   : > { %2061 = vmatpush3.bf16.msra.mxu0 %v2346_v5  ;;  %721 = vmatprep.mubr.bf16.mxu0 %v1811_v56  ;;  %v2365_v5 = vld [vmem:[%s2997_s1 + $0x88] sm:$0xff]   ;;  %v1747_v15 = vcombine.low %v253_v9, %v254_v10  ;;  %v2396_v8 = vld [vmem:[%s2997_s1 + $0x180] sm:$0xff]   ;;  %v2405_v10 = vld [vmem:[%s2999_s3 + $0x10] sm:$0xff]  }
  0x37   : > { %2062 = vmatprep.subr.bf16.mxu0 %v2348_v14  ;;  %2193 = vmatmul.mubr.bf16.gmra.mxu1 %v1815_v57  ;;  %v2364_v14 = vld [vmem:[%s2997_s1 + $0x8] sm:$0xff]   ;;  %v2397_v57 = vld [vmem:[%s2997_s1 + $0x200] sm:$0xff]  }
  0x38   : > { %2201 = vmatpush3.bf16.msra.mxu1 %v2347_v3  ;;  %v2740_v3 = vor.u32 %v451_v62, %v447_v58  ;;  %v314_v20 = vshrl.u32 %v1747_v15, 16  ;;  %v316_v23 = vshll.u32 %v1747_v15, 16  ;;  %v2393_v56 = vld [vmem:[%s2997_s1 + $0x188] sm:$0xff]   ;;  %v2395_v58 = vld [vmem:[%s2997_s1 + $0x1c0] sm:$0xff]  }
  0x39   : > { %2202 = vmatprep.subr.bf16.mxu1 %v2350_v12 }
  0x3a   : > { %2063 = vmatpush3.bf16.msra.mxu0 %v2349_v25  ;;  %v1814_v7 = vcombine.low %v2738_v2, %v2740_v3  ;;  %v369_v25 = vrot.slane %v1747_v15, 1  ;;  %v318_v31 = vrot.slane %v316_v23, 1 }
  0x3b   : > { %2064 = vmatprep.subr.bf16.mxu0 %v2354_v42  ;;  %v2371_v42 = vld [vmem:[%s2997_s1 + $0x1f8] sm:$0xff]  }
  0x3c   : > { %2203 = vmatpush3.bf16.msra.mxu1 %v2350_v12  ;;  %v1813_v12 = vcombine.low %v2679_v18, %v2689_v30  ;;  %v1842_v33 = vcombine.low %v369_v25, %v370_v35  ;;  %v1840_v35 = vcombine.low %v253_v9, %v2559_v22  ;;  %v2797_v22 = vcombine.low %v373_v50, %v374_v17  ;;  %v2379_v50 = vld [vmem:[%s2997_s1 + $0x1a8] sm:$0xff]   ;;  %v2386_v17 = vld [vmem:[%s2997_s1 + $0x198] sm:$0xff]  }
  0x3d   : > { %2204 = vmatprep.subr.bf16.mxu1 %v2358_v38  ;;  %722 = vmatmul.mubr.bf16.gmra.mxu0 %v1810_v53  ;;  %v2376_v53 = vld [vmem:[%s2997_s1 + $0x230] sm:$0xff]   ;;  %v2404_v9 = vld [vmem:[%s2999_s3 + $0x18] sm:$0xff]  }
  0x3e   : > { %2065 = vmatpush3.bf16.msra.mxu0 %v2355_v46  ;;  %729 = vmatprep.mubr.bf16.mxu0 %v1814_v7  ;;  %v1845_v46 = vcombine.low %v371_v39, %v372_v45  ;;  %v2375_v39 = vld [vmem:[%s2997_s1 + $0x1b0] sm:$0xff]   ;;  %v2380_v45 = vld [vmem:[%s2997_s1 + $0x228] sm:$0xff]   ;;  %v2400_v7 = vld [vmem:[%s2999_s3 + $0x38] sm:$0xff]  }
  0x3f   : > { %2066 = vmatprep.subr.bf16.mxu0 %v2359_v60  ;;  %2212 = vmatprep.mubr.bf16.mxu1 %v1842_v33 }
  0x40   : > { %2205 = vmatpush3.bf16.msra.mxu1 %v2358_v38  ;;  %v319_v38 = vor.u32 %v318_v31, %v314_v20 }
  0x41   : > { %2206 = vmatprep.subr.bf16.mxu1 %v2361_v52 }
  0x42   : > { %2067 = vmatpush3.bf16.msra.mxu0 %v2360_v63  ;;  %v1841_v26 = vcombine.low %v319_v38, %v2609_v48  ;;  %v1851_v48 = vcombine.low %v375_v21, %v376_v43  ;;  %v1846_v21 = vcombine.low %v2595_v41, %v2654_v6  ;;  %v271_v43 = vld [vmem:[%s2550_s23 + $0x48] sm:$0xf]  ;;  %v2389_v41 = vld [vmem:[%s2997_s1 + $0x190] sm:$0xff]  }
  0x43   : > { %2068 = vmatprep.subr.bf16.mxu0 %v2363_v4  ;;  %v1925_v54 = vcombine.low %v2689_v30, %v271_v43  ;;  %v2392_v6 = vld [vmem:[%s2997_s1 + $0x1c8] sm:$0xff]   ;;  %v1876_v18 = vcombine.low %v271_v43, %v272_v59 }
  0x44   : > { %2207 = vmatpush3.bf16.msra.mxu1 %v2361_v52  ;;  %v2372_v52 = vld [vmem:[%s2997_s1 + $0x1b8] sm:$0xff]   ;;  %v2394_v30 = vld [vmem:[%s2997_s1 + $0x208] sm:$0xff]  }
  0x45   : > { %2208 = vmatprep.subr.bf16.mxu1 %v2365_v5  ;;  %730 = vmatmul.mubr.bf16.gmra.mxu0 %v1813_v12  ;;  %v1113_v60 = vrot.slane %v1876_v18, 1  ;;  %v1109_v61 = vshll.u32 %v1876_v18, 16  ;;  %v1107_v63 = vshrl.u32 %v1876_v18, 16  ;;  %v2406_v12 = vld [vmem:[%s2999_s3 + $0x8] sm:$0xff]  }
  0x46   : > { %2069 = vmatpush3.bf16.msra.mxu0 %v2364_v14  ;;  %1003 = vmatprep.mubr.bf16.mxu0 %v1841_v26  ;;  %v2407_v14 = vld [vmem:[%s2999_s3] sm:$0xff]  }
  0x47   : > { %2070 = vmatprep.subr.bf16.mxu0 %v2366_v19  ;;  %v1927_v62 = vcombine.low %v453_v51, %v1113_v60  ;;  %v1111_v2 = vrot.slane %v1109_v61, 1  ;;  %v2402_v51 = vld [vmem:[%s2999_s3 + $0x28] sm:$0xff]  }
  0x48   : > { %2209 = vmatpush3.bf16.msra.mxu1 %v2365_v5 }
  0x49   : > { %2210 = vmatprep.subr.bf16.mxu1 %v2368_v16  ;;  %v1112_v4 = vor.u32 %v1111_v2, %v1107_v63 }
  0x4a   : > { %2071 = vmatpush3.bf16.msra.mxu0 %v2367_v27 }
  0x4b   : > { %2108 = vmatprep.subr.bf16.mxu0 %v2371_v42  ;;  %v1926_v5 = vcombine.low %v2740_v3, %v1112_v4  ;;  %v2403_v3 = vld [vmem:[%s2999_s3 + $0x20] sm:$0xff]  }
  0x4c   : > { %2211 = vmatpush3.bf16.msra.mxu1 %v2368_v16 }
  0x4d   : > { %2220 = vmatprep.subr.bf16.mxu1 %v2373_v36  ;;  %1004 = vmatmul.mubr.bf16.vlgmr.msra.gmra.mxu0 %v1840_v35 }
  0x4e   : > { %2109 = vmatpush3.bf16.msra.mxu0 %v2372_v52  ;;  %1011 = vmatprep.mubr.bf16.mxu0 %v2791_v34 }
  0x4f   : > { %2213 = vmatmul.mubr.bf16.vlgmr.msra.gmra.mxu1 %v1845_v46  ;;  %2110 = vmatprep.subr.bf16.mxu0 %v2374_v28 }
  0x50   : > { %2221 = vmatpush3.bf16.msra.mxu1 %v2373_v36  ;;  %2216 = vmatprep.mubr.bf16.mxu1 %v2797_v22 }
  0x51   : > { %2222 = vmatprep.subr.bf16.mxu1 %v2376_v53 }
  0x52   : > { %2111 = vmatpush3.bf16.msra.mxu0 %v2375_v39 }
  0x53   : > { %2112 = vmatprep.subr.bf16.mxu0 %v2378_v47 }
  0x54   : > { %2223 = vmatpush3.bf16.msra.mxu1 %v2376_v53 }
  0x55   : > { %2224 = vmatprep.subr.bf16.mxu1 %v2380_v45  ;;  %1012 = vmatmul.mubr.bf16.gmra.mxu0 %v1843_v49 }
  0x56   : > { %2113 = vmatpush3.bf16.msra.mxu0 %v2379_v50  ;;  %1019 = vmatprep.mubr.bf16.mxu0 %v1847_v13 }
  0x57   : > { %2217 = vmatmul.mubr.bf16.gmra.mxu1 %v1851_v48  ;;  %2114 = vmatprep.subr.bf16.mxu0 %v2381_v11 }
  0x58   : > { %2225 = vmatpush3.bf16.msra.mxu1 %v2380_v45  ;;  %2236 = vmatprep.mubr.bf16.mxu1 %v1845_v46 }
  0x59   : > { %2226 = vmatprep.subr.bf16.mxu1 %v2383_v0 }
  0x5a   : > { %2115 = vmatpush3.bf16.msra.mxu0 %v2382_v24 }
  0x5b   : > { %2116 = vmatprep.subr.bf16.mxu0 %v2385_v1 }
  0x5c   : > { %2227 = vmatpush3.bf16.msra.mxu1 %v2383_v0 }
  0x5d   : > { %2228 = vmatprep.subr.bf16.mxu1 %v2387_v29  ;;  %1020 = vmatmul.mubr.bf16.gmra.mxu0 %v1846_v21 }
  0x5e   : > { %2117 = vmatpush3.bf16.msra.mxu0 %v2386_v17  ;;  %1027 = vmatprep.mubr.bf16.mxu0 %v1850_v55 }
  0x5f   : > { %2118 = vmatprep.subr.bf16.mxu0 %v2388_v32 }
  0x60   : > { %2229 = vmatpush3.bf16.msra.mxu1 %v2387_v29 }
  0x61   : > { %2230 = vmatprep.subr.bf16.mxu1 %v2390_v40 }
  0x62   : > { %2119 = vmatpush3.bf16.msra.mxu0 %v2389_v41 }
  0x63   : > { %2120 = vmatprep.subr.bf16.mxu0 %v2392_v6 }
  0x64   : > { %2231 = vmatpush3.bf16.msra.mxu1 %v2390_v40 }
  0x65   : > { %2232 = vmatprep.subr.bf16.mxu1 %v2394_v30  ;;  %1028 = vmatmul.mubr.bf16.gmra.mxu0 %v1849_v44 }
  0x66   : > { %2121 = vmatpush3.bf16.msra.mxu0 %v2393_v56  ;;  %1347 = vmatprep.mubr.bf16.mxu0 %v2791_v34 }
  0x67   : > { %2122 = vmatprep.subr.bf16.mxu0 %v2395_v58 }
  0x68   : > { %2233 = vmatpush3.bf16.msra.mxu1 %v2394_v30 }
  0x69   : > { %2234 = vmatprep.subr.bf16.mxu1 %v2397_v57 }
  0x6a   : > { %2123 = vmatpush3.bf16.msra.mxu0 %v2396_v8 }
  0x6b   : > { %2244 = vmatprep.subr.bf16.mxu0 %v2400_v7 }
  0x6c   : > { %2235 = vmatpush3.bf16.msra.mxu1 %v2397_v57 }
  0x6d   : > { %1348 = vmatmul.mubr.bf16.vlgmr.msra.gmra.mxu0 %v1843_v49  ;;  %2268 = vmatprep.subr.bf16.mxu1 %v2400_v7 }
  0x6e   : > { %1355 = vmatprep.mubr.bf16.mxu0 %v1847_v13  ;;  %2245 = vmatpush3.bf16.msra.mxu0 %v2400_v7 }
  0x6f   : > { %2237 = vmatmul.mubr.bf16.vlgmr.msra.gmra.mxu1 %v2797_v22  ;;  %2246 = vmatprep.subr.bf16.mxu0 %v2401_v37 }
  0x70   : > { %2240 = vmatprep.mubr.bf16.mxu1 %v1851_v48  ;;  %2276 = vmatpush3.bf16.msra.mxu1 %v2400_v7 }
  0x71   : > { %2269 = vmatprep.subr.bf16.mxu1 %v2401_v37 }
  0x72   : > { %2247 = vmatpush3.bf16.msra.mxu0 %v2401_v37 }
  0x73   : > { %2248 = vmatprep.subr.bf16.mxu0 %v2402_v51 }
  0x74   : > { %2277 = vmatpush3.bf16.msra.mxu1 %v2401_v37 }
  0x75   : > { %1356 = vmatmul.mubr.bf16.gmra.mxu0 %v1846_v21  ;;  %2270 = vmatprep.subr.bf16.mxu1 %v2402_v51 }
  0x76   : > { %1363 = vmatprep.mubr.bf16.mxu0 %v1850_v55  ;;  %2249 = vmatpush3.bf16.msra.mxu0 %v2402_v51 }
  0x77   : > { %2241 = vmatmul.mubr.bf16.gmra.mxu1 %v1927_v62  ;;  %2250 = vmatprep.subr.bf16.mxu0 %v2403_v3 }
  0x78   : > { %2278 = vmatpush3.bf16.msra.mxu1 %v2402_v51 }
  0x79   : > { %2271 = vmatprep.subr.bf16.mxu1 %v2403_v3 }
  0x7a   : > { %2251 = vmatpush3.bf16.msra.mxu0 %v2403_v3 }
  0x7b   : > { %2252 = vmatprep.subr.bf16.mxu0 %v2404_v9 }
  0x7c   : > { %2279 = vmatpush3.bf16.msra.mxu1 %v2403_v3 }
  0x7d   : > { %1364 = vmatmul.mubr.bf16.gmra.mxu0 %v1849_v44  ;;  %2272 = vmatprep.subr.bf16.mxu1 %v2404_v9 }
  0x7e   : > { %1371 = vmatprep.mubr.bf16.mxu0 %v1926_v5  ;;  %2253 = vmatpush3.bf16.msra.mxu0 %v2404_v9 }
  0x7f   : > { %2254 = vmatprep.subr.bf16.mxu0 %v2405_v10 }
  0x80   : > { %2280 = vmatpush3.bf16.msra.mxu1 %v2404_v9 }
  0x81   : > { %2273 = vmatprep.subr.bf16.mxu1 %v2405_v10 }
  0x82   : > { %2255 = vmatpush3.bf16.msra.mxu0 %v2405_v10 }
  0x83   : > { %2256 = vmatprep.subr.bf16.mxu0 %v2406_v12 }
  0x84   : > { %2281 = vmatpush3.bf16.msra.mxu1 %v2405_v10 }
  0x85   : > { %1372 = vmatmul.mubr.bf16.gmra.mxu0 %v1925_v54  ;;  %2274 = vmatprep.subr.bf16.mxu1 %v2406_v12 }
  0x86   : > { %2257 = vmatpush3.bf16.msra.mxu0 %v2406_v12 }
  0x87   : > { %2258 = vmatprep.subr.bf16.mxu0 %v2407_v14 }
  0x88   : > { %2282 = vmatpush3.bf16.msra.mxu1 %v2406_v12 }
  0x89   : > { %2275 = vmatprep.subr.bf16.mxu1 %v2407_v14 }
  0x8a   : > { %2259 = vmatpush3.bf16.msra.mxu0 %v2407_v14 }
  0x8c   : > { %2283 = vmatpush3.bf16.msra.mxu1 %v2407_v14 }
  0xed   : > { %v2020_v15 = vpop.f32.mrf.mxu0 }
  0xef   : > { %v2021_v16 = vpop.f32.mrf.mxu0  ;;  %v2904_v25 = vpop.f32.mrf.mxu1 }
  0xf0   : > { %v2022_v19 = vadd.f32 %v2021_v16, %v2020_v15 }
  0xf1   : > { %v2023_v20 = vpop.f32.mrf.mxu0  ;;  %v772_v33 = vpop.f32.mrf.mxu1 }
  0xf2   : > { %v773_v2 = vadd.f32 %v2022_v19, %v772_v33 }
  0xf3   : > { %v2024_v23 = vpop.f32.mrf.mxu0  ;;  %v2906_v46 = vpop.f32.mrf.mxu1 }
  0xf4   : > { %v2025_v4 = vadd.f32 %v2024_v23, %v2023_v20 }
  0xf5   : > { %v2026_v27 = vpop.f32.mrf.mxu0  ;;  %v775_v52 = vpop.f32.mrf.mxu1 }
  0xf6   : > { %v776_v10 = vadd.f32 %v2025_v4, %v775_v52 }
  0xf7   : > { %v2027_v31 = vpop.f32.mrf.mxu0  ;;  %v2912_v34 = vpop.f32.mrf.mxu1 }
  0xf8   : > { %v2028_v36 = vadd.f32 %v2027_v31, %v2026_v27 }
  0xf9   : > { %v2029_v38 = vpop.f32.mrf.mxu0  ;;  %v2916_v45 = vpop.f32.mrf.mxu1 }
  0xfb   : > { %v2030_v42 = vpop.f32.mrf.mxu0  ;;  %v2922_v50 = vpop.f32.mrf.mxu1 }
  0xfc   : > { %v2031_v19 = vadd.f32 %v2030_v42, %v2029_v38 }
  0xfd   : > { %v2032_v26 = vpop.f32.mrf.mxu0  ;;  %v2926_v13 = vpop.f32.mrf.mxu1 }
  0xff   : > { %v2033_v35 = vpop.f32.mrf.mxu0 }
 0x100   : > { %v2908_v53 = vadd.f32 %v2033_v35, %v2032_v26  ;;  %v781_v35 = vadd.f32 %v2904_v25, %v2028_v36 }
 0x101   : > { %v2910_v28 = vpop.f32.mrf.mxu0 }
 0x103   : > { %v2914_v22 = vpop.f32.mrf.mxu0 }
 0x105   : > { %v2038_v39 = vpop.f32.mrf.mxu0 }
 0x107   : > { %v2039_v47 = vpop.f32.mrf.mxu0 }
 0x108   : > { %v2918_v48 = vadd.f32 %v2039_v47, %v2038_v39 }
 0x109   : > { %v2920_v49 = vpop.f32.mrf.mxu0 }
 0x10b   : > { %v2924_v0 = vpop.f32.mrf.mxu0 }
 0x10d   : > { %v2072_v11 = vpop.f32.mrf.mxu0 }
 0x10f   : > { %v2073_v24 = vpop.f32.mrf.mxu0  ;;  %v2214_v29 = vpop.f32.mrf.mxu1 }
 0x110   : > { %v2074_v61 = vadd.f32 %v2073_v24, %v2072_v11  ;;  %v2950_v11 = vld [vmem:[%s2998_s2] ss:$0 sm:$0xff] }
 0x111   : > { %v2075_v1 = vpop.f32.mrf.mxu0  ;;  %v1070_v21 = vpop.f32.mrf.mxu1 }
 0x112   : > { %v1006_v51 = vadd.f32 %v2074_v61, %v773_v2 }
 0x113   : > { %v2076_v17 = vpop.f32.mrf.mxu0  ;;  %v2928_v43 = vpop.f32.mrf.mxu1 }
 0x114   : > { %v2077_v37 = vadd.f32 %v2076_v17, %v2075_v1  ;;  %v1071_v27 = vadd.f32 %v1070_v21, %v1006_v51 }
 0x115   : > { %v2078_v32 = vpop.f32.mrf.mxu0  ;;  %v1073_v41 = vpop.f32.mrf.mxu1 }
 0x116   : > { %v1009_v31 = vadd.f32 %v2077_v37, %v776_v10 }
 0x117   : > { %v2079_v40 = vpop.f32.mrf.mxu0  ;;  %v2930_v30 = vpop.f32.mrf.mxu1 }
 0x118   : > { %v2080_v15 = vadd.f32 %v2079_v40, %v2078_v32  ;;  %v1074_v24 = vadd.f32 %v1073_v41, %v1009_v31  ;;  %v784_v40 = vadd.f32 %v2906_v46, %v2031_v19  ;;  %v789_v41 = vadd.f32 %v2908_v53, %v2916_v45 }
 0x119   : > { %v2081_v54 = vpop.f32.mrf.mxu0  ;;  %v2932_v57 = vpop.f32.mrf.mxu1 }
 0x11a   : > { %v1014_v33 = vadd.f32 %v2080_v15, %v781_v35 }
 0x11b   : > { %v2082_v55 = vpop.f32.mrf.mxu0  ;;  %v2936_v8 = vpop.f32.mrf.mxu1 }
 0x11c   : > { %v2083_v1 = vadd.f32 %v2082_v55, %v2081_v54  ;;  %v1079_v42 = vadd.f32 %v2214_v29, %v1014_v33  ;;  %v2037_v54 = vadd.f32 %v2914_v22, %v2910_v28 }
 0x11d   : > { %v2084_v6 = vpop.f32.mrf.mxu0  ;;  %v2942_v62 = vpop.f32.mrf.mxu1 }
 0x11e   : > { %v1017_v2 = vadd.f32 %v2083_v1, %v784_v40 }
 0x11f   : > { %v2085_v44 = vpop.f32.mrf.mxu0 }
 0x120   : > { %v2086_v4 = vadd.f32 %v2085_v44, %v2084_v6  ;;  %v1082_v15 = vadd.f32 %v2928_v43, %v1017_v2 }
 0x121   : > { %v2087_v56 = vpop.f32.mrf.mxu0 }
 0x122   : > { %v1022_v6 = vadd.f32 %v2086_v4, %v789_v41 }
 0x123   : > { %v2088_v58 = vpop.f32.mrf.mxu0 }
 0x124   : > { %v1087_v35 = vadd.f32 %v2932_v57, %v1022_v6 }
 0x125   : > { %v2934_v59 = vpop.f32.mrf.mxu0 }
 0x127   : > { %v2938_v18 = vpop.f32.mrf.mxu0 }
 0x129   : > { %v2940_v60 = vpop.f32.mrf.mxu0 }
 0x12b   : > { %v2944_v63 = vpop.f32.mrf.mxu0 }
 0x12d   : > { %v2124_v7 = vpop.f32.mrf.mxu0 }
 0x12f   : > { %v2238_v5 = vpop.f32.mrf.mxu1  ;;  %v2125_v9 = vpop.f32.mrf.mxu0 }
 0x130   : > { %v2126_v12 = vadd.f32 %v2125_v9, %v2124_v7 }
 0x131   : > { %v1414_v3 = vpop.f32.mrf.mxu1  ;;  %v2127_v16 = vpop.f32.mrf.mxu0 }
 0x132   : > { %v1415_v26 = vadd.f32 %v2126_v12, %v1414_v3  ;;  %v2089_v12 = vadd.f32 %v2088_v58, %v2087_v56  ;;  %v2092_v56 = vadd.f32 %v2938_v18, %v2934_v59  ;;  %v2095_v59 = vadd.f32 %v2944_v63, %v2940_v60 }
 0x133   : > { %v2239_v14 = vpop.f32.mrf.mxu1  ;;  %v2128_v39 = vpop.f32.mrf.mxu0 }
 0x134   : > { %v1445_v20 = vadd.f32 %v1415_v26, %v1071_v27  ;;  %v2129_v23 = vadd.f32 %v2128_v39, %v2127_v16 }
 0x135   : > { %v1417_v47 = vpop.f32.mrf.mxu1  ;;  %v2130_v52 = vpop.f32.mrf.mxu0 }
 0x136   : > { %v1418_v17 = vadd.f32 %v2129_v23, %v1417_v47  ;;  %v1460_v25 = vadd.f32 %v2950_v11, %v1445_v20 }
 0x137   : > { %v2131_v21 = vpop.f32.mrf.mxu0  ;;  %v2242_v32 = vpop.f32.mrf.mxu1 }
 0x138   : > { %v1446_v36 = vadd.f32 %v1418_v17, %v1074_v24  ;;  %v2132_v38 = vadd.f32 %v2131_v21, %v2130_v52  ;;  %v1468_v46 = vmax.f32 %v1460_v25, 0.0 }
 0x139   : > { %v2133_v61 = vpop.f32.mrf.mxu0  ;;  %v1430_v51 = vpop.f32.mrf.mxu1 }
 0x13a   : > { %v1461_v7 = vadd.f32 %v2950_v11, %v1446_v36  ;;  %v1423_v37 = vadd.f32 %v2238_v5, %v2132_v38  ;;  %v792_v5 = vadd.f32 %v2037_v54, %v2926_v13  ;;  %v797_v13 = vadd.f32 %v2912_v34, %v2918_v48 }
 0x13b   : > { %v2134_v55 = vpop.f32.mrf.mxu0  ;;  %v2243_v53 = vpop.f32.mrf.mxu1 }
 0x13c   : > { %v1469_v3 = vmax.f32 %v1461_v7, 0.0  ;;  %v1447_v9 = vadd.f32 %v1423_v37, %v1079_v42  ;;  %v2135_v10 = vadd.f32 %v2134_v55, %v2133_v61  ;;  %v1025_v31 = vadd.f32 %v2089_v12, %v792_v5 }
 0x13d   : > { %v2136_v29 = vpop.f32.mrf.mxu0  ;;  %v1433_v47 = vpop.f32.mrf.mxu1  ;;  %v1030_v24 = vadd.f32 %v2092_v56, %v797_v13 }
 0x13e   : > { %v1426_v44 = vadd.f32 %v2239_v14, %v2135_v10  ;;  %v1476_v16 = vpack.c.bf16 %v1469_v3, %v1468_v46  ;;  %v1462_v45 = vadd.f32 %v2950_v11, %v1447_v9  ;;  %v2043_v14 = vadd.f32 %v2924_v0, %v2920_v49 }
 0x13f   : > { %v2137_v27 = vpop.f32.mrf.mxu0  ;;  %v1090_v57 = vadd.f32 %v2942_v62, %v1025_v31  ;;  %v1095_v40 = vadd.f32 %v2930_v30, %v1030_v24 }
 0x140   : > { %v1448_v28 = vadd.f32 %v1426_v44, %v1082_v15  ;;  %v2138_v22 = vadd.f32 %v2137_v27, %v2136_v29  ;;  %2260 = vmatprep.mubr.bf16.mxu0 %v1476_v16  ;;  %v1470_v19 = vmax.f32 %v1462_v45, 0.0  ;;  %v800_v34 = vadd.f32 %v2922_v50, %v2043_v14 }
 0x141   : > { %v2139_v26 = vpop.f32.mrf.mxu0 }
 0x142   : > { %v1463_v43 = vadd.f32 %v2950_v11, %v1448_v28  ;;  %v1431_v58 = vadd.f32 %v2138_v22, %v1430_v51  ;;  %v1033_v25 = vadd.f32 %v2095_v59, %v800_v34  ;;  %v1953_v51 = vld [vmem:[%s3000_s4] ss:$0 sm:$0xff] }
 0x143   : > { %v2140_v39 = vpop.f32.mrf.mxu0 }
 0x144   : > { %v1471_v20 = vmax.f32 %v1463_v43, 0.0  ;;  %v1449_v23 = vadd.f32 %v1431_v58, %v1087_v35  ;;  %v2141_v33 = vadd.f32 %v2140_v39, %v2139_v26  ;;  %v1098_v50 = vadd.f32 %v2936_v8, %v1033_v25 }
 0x145   : > { %v2142_v52 = vpop.f32.mrf.mxu0 }
 0x146   : > { %v1477_v18 = vpack.c.bf16 %v1471_v20, %v1470_v19  ;;  %v1434_v1 = vadd.f32 %v2141_v33, %v1433_v47  ;;  %v1464_v48 = vadd.f32 %v2950_v11, %v1449_v23 }
 0x147   : > { %v2143_v17 = vpop.f32.mrf.mxu0 }
 0x148   : > { %v1450_v49 = vadd.f32 %v1434_v1, %v1090_v57  ;;  %v2144_v0 = vadd.f32 %v2143_v17, %v2142_v52  ;;  %2261 = vmatmul.mubr.bf16.vlgmr.msra.gmra.mxu0 %v1477_v18  ;;  %v1472_v42 = vmax.f32 %v1464_v48, 0.0 }
 0x149   : > { %v2145_v21 = vpop.f32.mrf.mxu0 }
 0x14a   : > { %v1465_v62 = vadd.f32 %v2950_v11, %v1450_v49  ;;  %v1439_v36 = vadd.f32 %v2242_v32, %v2144_v0 }
 0x14b   : > { %v2146_v38 = vpop.f32.mrf.mxu0 }
 0x14c   : > { %v1473_v60 = vmax.f32 %v1465_v62, 0.0  ;;  %v1451_v63 = vadd.f32 %v1439_v36, %v1095_v40  ;;  %v2147_v61 = vadd.f32 %v2146_v38, %v2145_v21 }
 0x14e   : > { %v1442_v2 = vadd.f32 %v2243_v53, %v2147_v61  ;;  %v1478_v4 = vpack.c.bf16 %v1473_v60, %v1472_v42  ;;  %v1466_v7 = vadd.f32 %v2950_v11, %v1451_v63 }
 0x150   : > { %v1452_v37 = vadd.f32 %v1442_v2, %v1098_v50  ;;  %2264 = vmatprep.mubr.bf16.mxu1 %v1478_v4  ;;  %v1474_v41 = vmax.f32 %v1466_v7, 0.0 }
 0x152   : > { %v1467_v30 = vadd.f32 %v2950_v11, %v1452_v37 }
 0x154   : > { %v1475_v54 = vmax.f32 %v1467_v30, 0.0 }
 0x156   : > { %v1479_v55 = vpack.c.bf16 %v1475_v54, %v1474_v41 }
 0x158   : > { %2265 = vmatmul.mubr.bf16.vlgmr.msra.gmra.mxu1 %v1479_v55 }
 0x208   : > { %v2262_v32 = vpop.f32.mrf.mxu0 }
 0x209   : > { %v1594_v3 = vadd.f32 %v2262_v32, %v1953_v51 }
 0x20a   : > { %v1585_v46 = vpop.f32.mrf.mxu0 }
 0x20b   : > { %v1586_v11 = vadd.f32 %v1953_v51, %v1585_v46 }
 0x20c   : > { %v2263_v8 = vpop.f32.mrf.mxu0 }
 0x20d   : > { %v1597_v9 = vadd.f32 %v2263_v8, %v1953_v51 }
 0x20e   : > { %v1588_v10 = vpop.f32.mrf.mxu0 }
 0x20f   : > { %v1989_v12 = vpack.c.bf16 %v1597_v9, %v1594_v3  ;;  %v1589_v29 = vadd.f32 %v1953_v51, %v1588_v10 }
 0x211   : > { %2001 = vst [vmem:[%s246_s29 + $0x8] sm:$0xff] %v1989_v12   ;;  %v1984_v15 = vpack.c.bf16 %v1589_v29, %v1586_v11 }
 0x213   : > { %1985 = vst [vmem:[%s246_s29] sm:$0xff] %v1984_v15  }
 0x218   : > { %v2266_v6 = vpop.f32.mrf.mxu1 }
 0x219   : > { %v1610_v5 = vadd.f32 %v2266_v6, %v1953_v51 }
 0x21a   : > { %v1601_v44 = vpop.f32.mrf.mxu1 }
 0x21b   : > { %v1602_v45 = vadd.f32 %v1953_v51, %v1601_v44 }
 0x21c   : > { %v2267_v16 = vpop.f32.mrf.mxu1 }
 0x21d   : > { %v1613_v27 = vadd.f32 %v2267_v16, %v1953_v51 }
 0x21e   : > { %v1604_v53 = vpop.f32.mrf.mxu1 }
 0x21f   : > { %v1999_v28 = vpack.c.bf16 %v1613_v27, %v1610_v5  ;;  %v1605_v22 = vadd.f32 %v1953_v51, %v1604_v53 }
 0x221   : > { %2003 = vst [vmem:[%s246_s29 + $0x18] sm:$0xff] %v1999_v28   ;;  %v1994_v31 = vpack.c.bf16 %v1605_v22, %v1602_v45 }
 0x223   : > { %2002 = vst [vmem:[%s246_s29 + $0x10] sm:$0xff] %v1994_v31  }
 0x224 PF: > { %s15_s20 = sadd.s32 1, %s2430_s20   ;;  %s3002_s18 = smov %s2426_s19 }
 0x225   : > { %p12_p5 = scmp.ge.s32.totalorder %s15_s20, 4   ;;  %s3003_s19 = smov %s3005_s21 }
 0x227   :  { %14 = sbr.rel (!%p12_p5) target bundleno = 2 (0x2), region = 73 }

</bundles_post_ra>
